<compile_context>
chip_gen: v5e
topology: v5e:2x2
jax: 0.10.0
libtpu: 0.0.40
codegen_flags: <defaults>
</compile_context>

<pallas_src>
import functools

import jax
import jax.numpy as jnp
import numpy as np
from jax import lax
from jax.experimental import pallas as pl
from jax.experimental.pallas import tpu as pltpu

EPS = 1e-5      # torch.nn.InstanceNorm2d default eps
GAMMA = 0.1     # init.constant_(norm.weight, 0.1); norm bias init to 0 -> omitted


def gala_kernel(xp_ref, wf_ref, out_ref, col_ref, *, H, W, K):
    # xp_ref : (1, C, Hp, Wp)        spatially padded input, one batch element
    # wf_ref : (Cout+1, C*K*K + 1)   fused conv weights + bias column
    #                                rows 0..Cout-1: SE (center tap only)
    #                                row  Cout     : SA (all K*K taps)
    # out_ref: (1, Cout, H*W)        lane-dense output
    # col_ref: (C*K*K + 1, H*W)      VMEM im2col scratch (last row = ones)
    C = xp_ref.shape[1]
    Cout = out_ref.shape[1]
    HW = out_ref.shape[2]
    CKK = C * K * K

    xp = xp_ref[0].astype(jnp.float32)                     # (C, Hp, Wp)

    # ---- in-kernel im2col: pack K*K shifted windows + a ones row -------------
    for i in range(K):
        for j in range(K):
            t = i * K + j
            tap = xp[:, i:i + H, j:j + W].reshape(C, HW)   # (C, H*W)
            col_ref[t * C:(t + 1) * C, :] = tap
    # ones row feeds the bias column of the fused weight (re-written every step
    # on purpose: scratch must be valid on every core under megacore sharding).
    col_ref[CKK:CKK + 1, :] = jnp.ones((1, HW), jnp.float32)

    # ---- single fused MXU matmul: conv(SE)+bias and conv(SA)+bias ------------
    wf = wf_ref[...].astype(jnp.float32)                   # (Cout+1, CKK+1)
    y = jnp.dot(wf, col_ref[...], preferred_element_type=jnp.float32)
    y = jnp.maximum(y, 0.0)                                # ReLU, (Cout+1, HW)

    # ---- shared InstanceNorm (per row over the spatial/lane axis) ------------
    mu = jnp.mean(y, axis=1, keepdims=True)
    var = jnp.mean((y - mu) ** 2, axis=1, keepdims=True)   # biased variance
    y = GAMMA * (y - mu) * lax.rsqrt(var + EPS)

    se = y[:Cout, :]                                       # (Cout, HW)
    sa = y[Cout:Cout + 1, :]                               # (1, HW)

    # ---- combine: SA broadcasts across channels; lane-dense store ------------
    out_ref[0] = (sa * se).astype(out_ref.dtype)


def gala_attention(x, w_se, b_se, w_sa, b_sa):
    """x: (N, C, H, W) NCHW float32.  Returns (N, Cout, H, W)."""
    N, C, H, W = x.shape
    Cout = w_se.shape[0]
    K = w_sa.shape[1]
    pad = (K - 1) // 2
    HW = H * W
    CKK = C * K * K

    # "same" padding for the KxK saliency conv (glue, done outside the kernel).
    xp = jnp.pad(x, ((0, 0), (0, 0), (pad, pad), (pad, pad)))
    Hp, Wp = H + 2 * pad, W + 2 * pad

    # Fused weight (glue / weight prep): (Cout+1, C*K*K + 1).
    #   im2col row ordering is tap-major: row (i*K + j)*C + c  <->  xp[c, h+i, w+j]
    #   last column holds the biases (paired with the in-kernel ones row).
    center = (pad * K + pad) * C
    wf = jnp.zeros((Cout + 1, CKK + 1), jnp.float32)
    wf = wf.at[:Cout, center:center + C].set(w_se.astype(jnp.float32))
    wsa_flat = jnp.transpose(w_sa.astype(jnp.float32), (1, 2, 0)).reshape(CKK)
    wf = wf.at[Cout, :CKK].set(wsa_flat)
    wf = wf.at[:Cout, CKK].set(b_se.astype(jnp.float32))
    wf = wf.at[Cout, CKK].set(b_sa.reshape(()).astype(jnp.float32))

    kernel = functools.partial(gala_kernel, H=H, W=W, K=K)

    out_flat = pl.pallas_call(
        kernel,
        out_shape=jax.ShapeDtypeStruct((N, Cout, HW), x.dtype),
        grid_spec=pltpu.PrefetchScalarGridSpec(
            num_scalar_prefetch=0,
            grid=(N,),
            in_specs=[
                pl.BlockSpec((1, C, Hp, Wp), lambda n: (n, 0, 0, 0)),
                pl.BlockSpec((Cout + 1, CKK + 1), lambda n: (0, 0)),
            ],
            out_specs=pl.BlockSpec((1, Cout, HW), lambda n: (n, 0, 0)),
            scratch_shapes=[pltpu.VMEM((CKK + 1, HW), jnp.float32)],
        ),
        compiler_params=pltpu.CompilerParams(
            dimension_semantics=("parallel",)),
    )(xp, wf)

    return out_flat.reshape(N, Cout, H, W)


# ----------------------- deterministic parameter init --------------------------
def orthogonal_conv_init(key, shape):
    """Mimics torch.nn.init.orthogonal_ on a conv weight of shape (out, in, kh, kw)."""
    rows = shape[0]
    cols = int(np.prod(shape[1:]))
    a = jax.random.normal(key, (max(rows, cols), min(rows, cols)), jnp.float32)
    q, r = jnp.linalg.qr(a)
    q = q * jnp.sign(jnp.diagonal(r))[None, :]
    if rows < cols:
        q = q.T
    return q.reshape(shape).astype(jnp.float32)


# ----------------------------- pure-JAX reference ------------------------------
def gala_reference(x, w_se4, b_se, w_sa4, b_sa):
    dn = ("NCHW", "OIHW", "NCHW")

    def instnorm(y):
        mu = y.mean(axis=(2, 3), keepdims=True)
        var = ((y - mu) ** 2).mean(axis=(2, 3), keepdims=True)
        return GAMMA * (y - mu) / jnp.sqrt(var + EPS)

    se = lax.conv_general_dilated(x, w_se4, (1, 1), "SAME", dimension_numbers=dn)
    se = instnorm(jnp.maximum(se + b_se.reshape(1, -1, 1, 1), 0.0))
    sa = lax.conv_general_dilated(x, w_sa4, (1, 1), "SAME", dimension_numbers=dn)
    sa = instnorm(jnp.maximum(sa + b_sa.reshape(1, 1, 1, 1), 0.0))
    return sa * se


if __name__ == "__main__":
    # Module config: GALA_Attention(input_size=4, output_size=4,
    #                               saliency_filter_size=3, layers=1)
    N, C_in, C_out, H, W, K = 2, 4, 4, 16, 16, 3

    key = jax.random.PRNGKey(0)
    kx, kse, ksa = jax.random.split(key, 3)

    x = jax.random.normal(kx, (N, C_in, H, W), jnp.float32)

    # Conv weights in PyTorch layout (out, in, kh, kw), orthogonal init, zero bias.
    w_se4 = orthogonal_conv_init(kse, (C_out, C_in, 1, 1))
    w_sa4 = orthogonal_conv_init(ksa, (1, C_in, K, K))
    b_se = jnp.zeros((C_out,), jnp.float32)
    b_sa = jnp.zeros((1,), jnp.float32)

    # Kernel-side layouts.
    w_se = w_se4[:, :, 0, 0]                 # (Cout, Cin)
    w_sa = w_sa4[0]                          # (Cin, K, K)

    out = gala_attention(x, w_se, b_se, w_sa, b_sa)
    out = jax.block_until_ready(out)

    ref = jax.block_until_ready(gala_reference(x, w_se4, b_se, w_sa4, b_sa))
    np.testing.assert_allclose(np.asarray(out), np.asarray(ref),
                               rtol=1e-4, atol=1e-4)

    print("KERNEL_OK")
</pallas_src>

<mosaic_0001>
module attributes {stable_mosaic.version = 11 : i64} {
  func.func @gala_kernel(%arg0: i32, %arg1: memref<1x4x18x18xf32, #tpu.memory_space<vmem>>, %arg2: memref<5x37xf32, #tpu.memory_space<vmem>>, %arg3: memref<1x4x256xf32, #tpu.memory_space<vmem>>, %arg4: memref<37x256xf32, #tpu.memory_space<vmem>>) attributes {dimension_semantics = [#tpu.dimension_semantics<parallel>], iteration_bounds = array<i64: 2>, scalar_prefetch = 0 : i64, scratch_operands = 1 : i64, tpu.core_type = #tpu.core_type<tc>, window_params = [{transform_indices = @transform_0, window_bounds = array<i64: 1, 4, 18, 18>}, {pipeline_mode = #tpu.pipeline_mode<synchronous>, transform_indices = @transform_1, window_bounds = array<i64: 5, 37>}, {transform_indices = @transform_2, window_bounds = array<i64: 1, 4, 256>}]} {
    %c0 = arith.constant 0 : index
    %c0_0 = arith.constant 0 : index
    %c0_1 = arith.constant 0 : index
    %c0_2 = arith.constant 0 : index
    %0 = vector.load %arg1[%c0, %c0_0, %c0_1, %c0_2] : memref<1x4x18x18xf32, #tpu.memory_space<vmem>>, vector<1x4x18x18xf32>
    %1 = vector.shape_cast %0 : vector<1x4x18x18xf32> to vector<4x18x18xf32>
    %2 = vector.extract_strided_slice %1 {offsets = [0, 0, 0], sizes = [4, 16, 16], strides = [1, 1, 1]} : vector<4x18x18xf32> to vector<4x16x16xf32>
    %3 = vector.shape_cast %2 : vector<4x16x16xf32> to vector<4x256xf32>
    %c0_3 = arith.constant 0 : index
    %c0_4 = arith.constant 0 : index
    %4 = vector.load %arg4[%c0_3, %c0_4] : memref<37x256xf32, #tpu.memory_space<vmem>>, vector<4x256xf32>
    tpu.vector_store %arg4[%c0_3, %c0_4], %3 {strides = array<i32>} : memref<37x256xf32, #tpu.memory_space<vmem>>, vector<4x256xf32>,
    %5 = vector.extract_strided_slice %1 {offsets = [0, 0, 1], sizes = [4, 16, 16], strides = [1, 1, 1]} : vector<4x18x18xf32> to vector<4x16x16xf32>
    %6 = vector.shape_cast %5 : vector<4x16x16xf32> to vector<4x256xf32>
    %c4 = arith.constant 4 : index
    %c0_5 = arith.constant 0 : index
    %7 = vector.load %arg4[%c4, %c0_5] : memref<37x256xf32, #tpu.memory_space<vmem>>, vector<4x256xf32>
    tpu.vector_store %arg4[%c4, %c0_5], %6 {strides = array<i32>} : memref<37x256xf32, #tpu.memory_space<vmem>>, vector<4x256xf32>,
    %8 = vector.extract_strided_slice %1 {offsets = [0, 0, 2], sizes = [4, 16, 16], strides = [1, 1, 1]} : vector<4x18x18xf32> to vector<4x16x16xf32>
    %9 = vector.shape_cast %8 : vector<4x16x16xf32> to vector<4x256xf32>
    %c8 = arith.constant 8 : index
    %c0_6 = arith.constant 0 : index
    %10 = vector.load %arg4[%c8, %c0_6] : memref<37x256xf32, #tpu.memory_space<vmem>>, vector<4x256xf32>
    tpu.vector_store %arg4[%c8, %c0_6], %9 {strides = array<i32>} : memref<37x256xf32, #tpu.memory_space<vmem>>, vector<4x256xf32>,
    %11 = vector.extract_strided_slice %1 {offsets = [0, 1, 0], sizes = [4, 16, 16], strides = [1, 1, 1]} : vector<4x18x18xf32> to vector<4x16x16xf32>
    %12 = vector.shape_cast %11 : vector<4x16x16xf32> to vector<4x256xf32>
    %c12 = arith.constant 12 : index
    %c0_7 = arith.constant 0 : index
    %13 = vector.load %arg4[%c12, %c0_7] : memref<37x256xf32, #tpu.memory_space<vmem>>, vector<4x256xf32>
    tpu.vector_store %arg4[%c12, %c0_7], %12 {strides = array<i32>} : memref<37x256xf32, #tpu.memory_space<vmem>>, vector<4x256xf32>,
    %14 = vector.extract_strided_slice %1 {offsets = [0, 1, 1], sizes = [4, 16, 16], strides = [1, 1, 1]} : vector<4x18x18xf32> to vector<4x16x16xf32>
    %15 = vector.shape_cast %14 : vector<4x16x16xf32> to vector<4x256xf32>
    %c16 = arith.constant 16 : index
    %c0_8 = arith.constant 0 : index
    %16 = vector.load %arg4[%c16, %c0_8] : memref<37x256xf32, #tpu.memory_space<vmem>>, vector<4x256xf32>
    tpu.vector_store %arg4[%c16, %c0_8], %15 {strides = array<i32>} : memref<37x256xf32, #tpu.memory_space<vmem>>, vector<4x256xf32>,
    %17 = vector.extract_strided_slice %1 {offsets = [0, 1, 2], sizes = [4, 16, 16], strides = [1, 1, 1]} : vector<4x18x18xf32> to vector<4x16x16xf32>
    %18 = vector.shape_cast %17 : vector<4x16x16xf32> to vector<4x256xf32>
    %c20 = arith.constant 20 : index
    %c0_9 = arith.constant 0 : index
    %19 = vector.load %arg4[%c20, %c0_9] : memref<37x256xf32, #tpu.memory_space<vmem>>, vector<4x256xf32>
    tpu.vector_store %arg4[%c20, %c0_9], %18 {strides = array<i32>} : memref<37x256xf32, #tpu.memory_space<vmem>>, vector<4x256xf32>,
    %20 = vector.extract_strided_slice %1 {offsets = [0, 2, 0], sizes = [4, 16, 16], strides = [1, 1, 1]} : vector<4x18x18xf32> to vector<4x16x16xf32>
    %21 = vector.shape_cast %20 : vector<4x16x16xf32> to vector<4x256xf32>
    %c24 = arith.constant 24 : index
    %c0_10 = arith.constant 0 : index
    %22 = vector.load %arg4[%c24, %c0_10] : memref<37x256xf32, #tpu.memory_space<vmem>>, vector<4x256xf32>
    tpu.vector_store %arg4[%c24, %c0_10], %21 {strides = array<i32>} : memref<37x256xf32, #tpu.memory_space<vmem>>, vector<4x256xf32>,
    %23 = vector.extract_strided_slice %1 {offsets = [0, 2, 1], sizes = [4, 16, 16], strides = [1, 1, 1]} : vector<4x18x18xf32> to vector<4x16x16xf32>
    %24 = vector.shape_cast %23 : vector<4x16x16xf32> to vector<4x256xf32>
    %c28 = arith.constant 28 : index
    %c0_11 = arith.constant 0 : index
    %25 = vector.load %arg4[%c28, %c0_11] : memref<37x256xf32, #tpu.memory_space<vmem>>, vector<4x256xf32>
    tpu.vector_store %arg4[%c28, %c0_11], %24 {strides = array<i32>} : memref<37x256xf32, #tpu.memory_space<vmem>>, vector<4x256xf32>,
    %26 = vector.extract_strided_slice %1 {offsets = [0, 2, 2], sizes = [4, 16, 16], strides = [1, 1, 1]} : vector<4x18x18xf32> to vector<4x16x16xf32>
    %27 = vector.shape_cast %26 : vector<4x16x16xf32> to vector<4x256xf32>
    %c32 = arith.constant 32 : index
    %c0_12 = arith.constant 0 : index
    %28 = vector.load %arg4[%c32, %c0_12] : memref<37x256xf32, #tpu.memory_space<vmem>>, vector<4x256xf32>
    tpu.vector_store %arg4[%c32, %c0_12], %27 {strides = array<i32>} : memref<37x256xf32, #tpu.memory_space<vmem>>, vector<4x256xf32>,
    %cst = arith.constant 1.000000e+00 : f32
    %29 = vector.broadcast %cst : f32 to vector<1x256xf32>
    %c36 = arith.constant 36 : index
    %c0_13 = arith.constant 0 : index
    %30 = vector.load %arg4[%c36, %c0_13] : memref<37x256xf32, #tpu.memory_space<vmem>>, vector<1x256xf32>
    tpu.vector_store %arg4[%c36, %c0_13], %29 {strides = array<i32>} : memref<37x256xf32, #tpu.memory_space<vmem>>, vector<1x256xf32>,
    %c0_14 = arith.constant 0 : index
    %c0_15 = arith.constant 0 : index
    %31 = vector.load %arg2[%c0_14, %c0_15] : memref<5x37xf32, #tpu.memory_space<vmem>>, vector<5x37xf32>
    %c0_16 = arith.constant 0 : index
    %c0_17 = arith.constant 0 : index
    %32 = vector.load %arg4[%c0_16, %c0_17] : memref<37x256xf32, #tpu.memory_space<vmem>>, vector<37x256xf32>
    %cst_18 = arith.constant dense<0.000000e+00> : vector<5x256xf32>
    %33 = tpu.matmul %31, %32, %cst_18 {dimension_numbers = #tpu.dot_dimension_numbers<[1], [0], [0], [1], [0, 0, 1, 1], [], []>} : vector<5x37xf32>, vector<37x256xf32>, vector<5x256xf32> -> vector<5x256xf32>
    %cst_19 = arith.constant 0.000000e+00 : f32
    %34 = vector.broadcast %cst_19 : f32 to vector<5x256xf32>
    %35 = arith.maximumf %33, %34 : vector<5x256xf32>
    %cst_20 = arith.constant dense<0.000000e+00> : vector<5xf32>
    %36 = vector.multi_reduction <add>, %35, %cst_20 [1] : vector<5x256xf32> to vector<5xf32>
    %37 = vector.shape_cast %36 : vector<5xf32> to vector<5x1xf32>
    %cst_21 = arith.constant 2.560000e+02 : f32
    %38 = vector.broadcast %cst_21 : f32 to vector<5x1xf32>
    %39 = arith.divf %37, %38 : vector<5x1xf32>
    %40 = vector.broadcast %39 : vector<5x1xf32> to vector<5x256xf32>
    %41 = arith.subf %35, %40 : vector<5x256xf32>
    %42 = arith.mulf %41, %41 : vector<5x256xf32>
    %cst_22 = arith.constant dense<0.000000e+00> : vector<5xf32>
    %43 = vector.multi_reduction <add>, %42, %cst_22 [1] : vector<5x256xf32> to vector<5xf32>
    %44 = vector.shape_cast %43 : vector<5xf32> to vector<5x1xf32>
    %cst_23 = arith.constant 2.560000e+02 : f32
    %45 = vector.broadcast %cst_23 : f32 to vector<5x1xf32>
    %46 = arith.divf %44, %45 : vector<5x1xf32>
    %47 = vector.broadcast %39 : vector<5x1xf32> to vector<5x256xf32>
    %48 = arith.subf %35, %47 : vector<5x256xf32>
    %cst_24 = arith.constant 1.000000e-01 : f32
    %49 = vector.broadcast %cst_24 : f32 to vector<5x256xf32>
    %50 = arith.mulf %49, %48 : vector<5x256xf32>
    %cst_25 = arith.constant 9.99999974E-6 : f32
    %51 = vector.broadcast %cst_25 : f32 to vector<5x1xf32>
    %52 = arith.addf %46, %51 : vector<5x1xf32>
    %53 = math.rsqrt %52 : vector<5x1xf32>
    %54 = vector.broadcast %53 : vector<5x1xf32> to vector<5x256xf32>
    %55 = arith.mulf %50, %54 : vector<5x256xf32>
    %56 = vector.extract_strided_slice %55 {offsets = [0, 0], sizes = [4, 256], strides = [1, 1]} : vector<5x256xf32> to vector<4x256xf32>
    %57 = vector.extract_strided_slice %55 {offsets = [4, 0], sizes = [1, 256], strides = [1, 1]} : vector<5x256xf32> to vector<1x256xf32>
    %58 = vector.broadcast %57 : vector<1x256xf32> to vector<4x256xf32>
    %59 = arith.mulf %58, %56 : vector<4x256xf32>
    %c0_26 = arith.constant 0 : index
    %c0_27 = arith.constant 0 : index
    %c0_28 = arith.constant 0 : index
    %60 = vector.load %arg3[%c0_26, %c0_27, %c0_28] : memref<1x4x256xf32, #tpu.memory_space<vmem>>, vector<1x4x256xf32>
    %61 = vector.shape_cast %60 : vector<1x4x256xf32> to vector<4x256xf32>
    %62 = vector.shape_cast %59 : vector<4x256xf32> to vector<1x4x256xf32>
    tpu.vector_store %arg3[%c0_26, %c0_27, %c0_28], %62 {strides = array<i32>} : memref<1x4x256xf32, #tpu.memory_space<vmem>>, vector<1x4x256xf32>,
    return
  }
  func.func @transform_0(%arg0: i32) -> (i32, i32, i32, i32) {
    %c0_i32 = arith.constant 0 : i32
    %c0_i32_0 = arith.constant 0 : i32
    %c0_i32_1 = arith.constant 0 : i32
    %c0_i32_2 = arith.constant 0 : i32
    return %arg0, %c0_i32, %c0_i32_0, %c0_i32_1 : i32, i32, i32, i32
  }
  func.func @transform_1(%arg0: i32) -> (i32, i32) {
    %c0_i32 = arith.constant 0 : i32
    %c0_i32_0 = arith.constant 0 : i32
    %c0_i32_1 = arith.constant 0 : i32
    return %c0_i32, %c0_i32_0 : i32, i32
  }
  func.func @transform_2(%arg0: i32) -> (i32, i32, i32) {
    %c0_i32 = arith.constant 0 : i32
    %c0_i32_0 = arith.constant 0 : i32
    %c0_i32_1 = arith.constant 0 : i32
    return %arg0, %c0_i32, %c0_i32_0 : i32, i32, i32
  }
}

</mosaic_0001>

<bundles_post_ra>
// kernel: tpu_custom_call.1
= control target key start
LH: loop header
LB: loop body
LE: loop exit
PB: predicated region body
PF: predicated region fallthrough
CT: control target
= control target key end

     0   :  { %7 = vsyncpa [#allocation4], 0  ;;  %s3886_s0 = inlined_call_operand.vmem [shape: f32[2,4,18,18], index: 0, kind: input, shape index: {}]   ;;  %s3887_s1 = inlined_call_operand.vmem [shape: f32[5,37], index: 1, kind: input, shape index: {}]   ;;  %s3888_s2 = inlined_call_operand.hbm [shape: f32[2,4,256], index: 2, kind: output, shape index: {}]  }
   0x1   :  { %9 = vsyncpa [#allocation4 + $0x1], 0  ;;  %s2417_s9 = smov 0   ;;  %s2419_s10 = smov 0  }
   0x2   :  { %s2421_s11 = smov 0   ;;  %s2423_s12 = smov 0  }
   0x3 LB: > { %s2438_s13 = sadd.s32 4294967295, %s2387_s12   ;;  %s2252_s14 = sadd.s32 4294967294, %s2387_s12   ;;  %s2387_s12 = sphi %s2423_s12, %s3923_s12   ;;  %s2383_s11 = sphi %s2421_s11, %s3922_s11   ;;  %s2379_s10 = sphi %s2419_s10, %s3921_s10   ;;  %s2375_s9 = sphi %s2417_s9, %s3920_s9  }
   0x4   : > { %s2442_s15 = sadd.s32 1, %s2387_s12   ;;  %s69_s16 = sadd.s32 1, %s2383_s11 }
   0x5   : > { %s66_s17 = ssub.s32 %s2387_s12, %s2442_s15  ;;  %p79_p0 = scmp.ne.s32.totalorder %s2383_s11, %s2379_s10 }
   0x6   : > { %p67_p1 = scmp.eq.s32.totalorder %s66_s17, 0  ;;  %p80_p2 = scmp.eq.s32.totalorder %s2438_s13, 1 }
   0x7   : > { %p85_p3 = scmp.ne.s32.totalorder %s2379_s10, %s2375_s9  ;;  %p86_p4 = scmp.eq.s32.totalorder %s2252_s14, 1 }
   0x8   : > { %s2453_s18 = scalar_select %p67_p1, %s2383_s11, %s69_s16  }
   0x9   : > { %p2455_p5 = por %p80_p2, %p79_p0  ;;  %p2459_p6 = por %p86_p4, %p85_p3 }
   0xa   : > { %p2255_p7 = scmp.ge.s32.totalorder %s2387_s12, 1  ;;  %p115_p8 = scmp.lt.s32.totalorder %s2387_s12, 3 }
   0xc   : > { %p116_p9 = pnand %p2255_p7, %p115_p8 }
   0xe   : > { %119 = sbr.rel (%p116_p9) target bundleno = 1226 (0x4ca), region = 28 }
  0x13   : > { %p137_p10 = scmp.lt.s32.totalorder %s2438_s13, 1  ;;  %v2389_v0 = vmov 1983009808   ;;  %vm155_vm0 = vcmask 1047556   ;;  %v2390_v9 = vmov 1934713408  }
  0x14   : > { %v160_v1 = vunpack.c.l.s4 %v2389_v0  ;;  %v184_v10 = vunpack.c.l.s4 %v2390_v9  ;;  %s2391_s26 = smov 64   ;;  %s2392_s27 = smov 32   ;;  %vm323_vm1 = vcmask 130048   ;;  %vm325_vm2 = vcmask 261120  }
  0x15   : > { %s138_s21 = scalar_select %p137_p10, %s2438_s13, 1  ;;  %vm327_vm3 = vcmask 392192   ;;  %vm329_vm4 = vcmask 523264   ;;  %vm331_vm5 = vcmask 654336   ;;  %vm333_vm6 = vcmask 785408  }
  0x16   : > { %v2481_v5 = vunpack.c.0.s8 %v160_v1  ;;  %v2514_v25 = vunpack.c.0.s8 %v184_v10  ;;  %s2393_s28 = smov 96   ;;  %s2394_s29 = smov 48   ;;  %vm335_vm7 = vcmask 916480   ;;  %vm1421_vm8 = vcmask 1045504  }
  0x17   : > { %s2268_s22 = smul.u32 96, %s138_s21  ;;  %s2395_s30 = smov 16   ;;  %vm780_vm9 = vcmask 1046528   ;;  %vm2078_vm11 = vcmask 1044480   ;;  %vm2074_vm12 = vcmask 302080  }
  0x18   : > { %s2396_s3 = smov 112   ;;  %s2397_s4 = smov 80  }
  0x19   : > { %s2470_s25 = scalar_lea.vmem %s3886_s0, %s2268_s22  ;;  %s2398_s5 = smov 127  }
  0x1a   : > { %v2473_v2 = vld [vmem:[%s2470_s25] sm:$0xff]  ;;  %v2476_v3 = vld [vmem:[%s2470_s25 + $0x18] sm:$0xff]  ;;  %v2479_v4 = vld [vmem:[%s2470_s25 + $0x30] sm:$0xff]  ;;  %s2399_s6 = smov 126   ;;  %s134_s14 = sand.u32 1, %s2379_s10  }
  0x1b   : > { %v2484_v6 = vld [vmem:[%s2470_s25 + $0x48] sm:$0xff]  ;;  %v157_v7 = vrot.slane %v2473_v2, 4  ;;  %v169_v8 = vrot.slane %v2476_v3, 4  ;;  %v154_v11 = vrot.slane %v2479_v4, 4  ;;  %v2491_v13 = vld [vmem:[%s2470_s25 + $0x38] sm:$0xff]  ;;  %v2494_v14 = vld [vmem:[%s2470_s25 + $0x50] sm:$0xff] }
  0x1c   : > { %v167_v12 = vrot.slane %v2484_v6, 4  ;;  %v2503_v18 = vld [vmem:[%s2470_s25 + $0x8] sm:$0xff]  ;;  %v211_v19 = vrot.slane %v2491_v13, 4  ;;  %v2512_v24 = vld [vmem:[%s2470_s25 + $0x20] sm:$0xff]  ;;  %v223_v27 = vrot.slane %v2494_v14, 4  ;;  %s2256_s16 = sshll.u32 %s134_s14, 3 }
  0x1d   : > { %v158_v15 = vsel %vm155_vm0, %v2479_v4, %v157_v7  ;;  %v170_v16 = vsel %vm155_vm0, %v2484_v6, %v169_v8  ;;  %v156_v17 = vsel %vm155_vm0, %v154_v11, %v2473_v2  ;;  %v225_v34 = vrot.slane %v2512_v24, 4  ;;  %s2267_s17 = sshll.u32 %s2438_s13, 3  ;;  %s136_s24 = scalar_lea.vmem [#allocation3], %s2256_s16 }
  0x1e   : > { %v166_v20 = vperm.slane %v158_v15, %v2481_v5  ;;  %v178_v21 = vperm.slane %v170_v16, %v2481_v5  ;;  %v162_v22 = vperm.slane %v156_v17, %v2481_v5  ;;  %v168_v23 = vsel %vm155_vm0, %v167_v12, %v2476_v3  ;;  %s2188_s23 = scalar_lea.hbm %s3888_s2, %s2267_s17  ;;  %s2177_s13 = scalar_lea.sflag [#allocation4], %s134_s14 }
  0x1f   : > { %v174_v26 = vperm.slane %v168_v23, %v2481_v5  ;;  %v212_v31 = vsel %vm155_vm0, %v211_v19, %v2503_v18  ;;  %v224_v33 = vsel %vm155_vm0, %v223_v27, %v2512_v24  ;;  %v213_v50 = vrot.slane %v2503_v18, 4 }
  0x20   : > { %v191_v28 = vrot.slane %v178_v21, 4  ;;  %v193_v29 = vrot.slane %v166_v20, 4  ;;  %v181_v30 = vrot.slane %v162_v22, 4  ;;  %v230_v37 = vperm.slane %v224_v33, %v2481_v5 }
  0x21   : > { %v179_v32 = vrot.slane %v174_v26, 4  ;;  %v218_v42 = vperm.slane %v212_v31, %v2481_v5  ;;  %v226_v51 = vsel %vm155_vm0, %v2494_v14, %v225_v34  ;;  %v214_v57 = vsel %vm155_vm0, %v2491_v13, %v213_v50 }
  0x22   : > { %v192_v35 = vsel %vm155_vm0, %v191_v28, %v166_v20  ;;  %v182_v36 = vsel %vm155_vm0, %v174_v26, %v181_v30  ;;  %v194_v38 = vsel %vm155_vm0, %v178_v21, %v193_v29  ;;  %v235_v44 = vrot.slane %v230_v37, 4 }
  0x23   : > { %v198_v39 = vperm.slane %v192_v35, %v2514_v25  ;;  %v190_v40 = vperm.slane %v182_v36, %v2514_v25  ;;  %v180_v41 = vsel %vm155_vm0, %v179_v32, %v162_v22  ;;  %v202_v45 = vperm.slane %v194_v38, %v2514_v25 }
  0x24   : > { %v2532_v43 = vperm.slane %v180_v41, %v2514_v25  ;;  %v237_v46 = vrot.slane %v218_v42, 4  ;;  %v236_v49 = vsel %vm155_vm0, %v235_v44, %v218_v42  ;;  %v234_v56 = vperm.slane %v226_v51, %v2481_v5 }
  0x25   : > { %280 = vrot.lane.b32.xlu1 %v198_v39, %s2391_s26  ;;  %272 = vrot.lane.b32.xlu0 %v190_v40, %s2392_s27  ;;  %v205_v47 = vrot.slane %v190_v40, 4  ;;  %v2547_v55 = vperm.slane %v236_v49, %v2514_v25  ;;  %v209_v60 = vrot.slane %v202_v45, 4  ;;  %v222_v61 = vperm.slane %v214_v57, %v2481_v5 }
  0x26   : > { %v203_v48 = vrot.slane %v2532_v43, 4  ;;  %288 = vrot.lane.b32.xlu2 %v202_v45, %s2393_s28  ;;  %v238_v52 = vsel %vm155_vm0, %v230_v37, %v237_v46  ;;  %v247_v62 = vrot.slane %v234_v56, 4  ;;  %v207_v63 = vrot.slane %v198_v39, 4 }
  0x27   : > { %v206_v53 = vsel %vm155_vm0, 0.0, %v205_v47  ;;  %v246_v58 = vperm.slane %v238_v52, %v2514_v25  ;;  %v259_v59 = vrot.slane %v2547_v55, 4  ;;  %v210_v1 = vsel %vm155_vm0, 0.0, %v209_v60 }
  0x28   : > { %v204_v54 = vsel %vm155_vm0, 0.0, %v203_v48  ;;  %v248_v7 = vsel %vm155_vm0, %v247_v62, %v222_v61  ;;  %v249_v8 = vrot.slane %v222_v61, 4  ;;  %v208_v9 = vsel %vm155_vm0, 0.0, %v207_v63 }
  0x29   : > { %v260_v0 = vsel %vm155_vm0, 0.0, %v259_v59  ;;  %v254_v10 = vperm.slane %v248_v7, %v2514_v25  ;;  %v261_v11 = vrot.slane %v246_v58, 4 }
  0x2a   : > { %v250_v12 = vsel %vm155_vm0, %v234_v56, %v249_v8 }
  0x2b   : > { %v263_v15 = vrot.slane %v254_v10, 4  ;;  %v262_v16 = vsel %vm155_vm0, 0.0, %v261_v11  ;;  %v258_v17 = vperm.slane %v250_v12, %v2514_v25 }
  0x2d   : > { %276 = vrot.lane.b32.xlu1 %v206_v53, %s2394_s29  ;;  %268 = vrot.lane.b32.xlu0 %v204_v54, %s2395_s30  ;;  %v264_v19 = vsel %vm155_vm0, 0.0, %v263_v15  ;;  %v265_v20 = vrot.slane %v258_v17, 4 }
  0x2e   : > { %300 = vrot.lane.b32.xlu2 %v246_v58, %s2392_s27 }
  0x2f   : > { %v266_v21 = vsel %vm155_vm0, 0.0, %v265_v20 }
  0x35   : > { %296 = vrot.lane.b32.xlu1 %v260_v0, %s2395_s30  ;;  %292 = vrot.lane.b32.xlu0 %v210_v1, %s2396_s3 }
  0x36   : > { %284 = vrot.lane.b32.xlu2 %v208_v9, %s2397_s4 }
  0x3d   : > { %308 = vrot.lane.b32.xlu1 %v254_v10, %s2391_s26  ;;  %304 = vrot.lane.b32.xlu0 %v262_v16, %s2394_s29 }
  0x3e   : > { %312 = vrot.lane.b32.xlu2 %v264_v19, %s2397_s4 }
  0x45   : > { %320 = vrot.lane.b32.xlu1 %v266_v21, %s2396_s3  ;;  %316 = vrot.lane.b32.xlu0 %v258_v17, %s2393_s28 }
  0x46   : > { %354 = vrot.lane.b32.xlu2 %v2473_v2, %s2398_s5 }
  0x4d   : > { %358 = vrot.lane.b32.xlu1 %v2476_v3, %s2398_s5  ;;  %356 = vrot.lane.b32.xlu0 %v2503_v18, %s2398_s5 }
  0x4e   : > { %360 = vrot.lane.b32.xlu2 %v2512_v24, %s2398_s5 }
  0x55   : > { %364 = vrot.lane.b32.xlu1 %v2491_v13, %s2398_s5  ;;  %362 = vrot.lane.b32.xlu0 %v2479_v4, %s2398_s5 }
  0x56   : > { %366 = vrot.lane.b32.xlu2 %v2484_v6, %s2398_s5 }
  0x5d   : > { %570 = vrot.lane.b32.xlu1 %v2503_v18, %s2399_s6  ;;  %368 = vrot.lane.b32.xlu0 %v2494_v14, %s2398_s5 }
  0x5e   : > { %572 = vrot.lane.b32.xlu2 %v2476_v3, %s2399_s6 }
  0x65   : > { %576 = vrot.lane.b32.xlu1 %v2479_v4, %s2399_s6  ;;  %568 = vrot.lane.b32.xlu0 %v2473_v2, %s2399_s6 }
  0x66   : > { %578 = vrot.lane.b32.xlu2 %v2491_v13, %s2399_s6 }
  0x6d   : > { %582 = vrot.lane.b32.xlu1 %v2494_v14, %s2399_s6  ;;  %574 = vrot.lane.b32.xlu0 %v2512_v24, %s2399_s6 }
  0x75   : > { %580 = vrot.lane.b32.xlu0 %v2484_v6, %s2399_s6 }
  0x80   : > { %v289_v22 = vpop.permute.xlu2 %288 }
  0x88   : > { %v301_v23 = vpop.permute.xlu2 %300 }
  0x90   : > { %v285_v28 = vpop.permute.xlu2 %284 }
  0x97   : > { %v281_v26 = vpop.permute.xlu1 %280  ;;  %v273_v27 = vpop.permute.xlu0 %272 }
  0x98   : > { %v313_v32 = vpop.permute.xlu2 %312 }
  0x9f   : > { %v277_v29 = vpop.permute.xlu1 %276  ;;  %v269_v30 = vpop.permute.xlu0 %268 }
  0xa0   : > { %v324_v31 = vsel %vm323_vm1, %v2532_v43, %v269_v30  ;;  %v355_v41 = vpop.permute.xlu2 %354 }
  0xa1   : > { %v326_v33 = vsel %vm325_vm2, %v324_v31, %v273_v27  ;;  %v380_v59 = vrot.slane %v355_v41, 4 }
  0xa2   : > { %v328_v34 = vsel %vm327_vm3, %v326_v33, %v277_v29 }
  0xa3   : > { %v330_v35 = vsel %vm329_vm4, %v328_v34, %v281_v26 }
  0xa4   : > { %v332_v36 = vsel %vm331_vm5, %v330_v35, %v285_v28 }
  0xa5   : > { %v334_v38 = vsel %vm333_vm6, %v332_v36, %v289_v22 }
  0xa7   : > { %v297_v37 = vpop.permute.xlu1 %296  ;;  %v293_v39 = vpop.permute.xlu0 %292 }
  0xa8   : > { %v336_v40 = vsel %vm335_vm7, %v334_v38, %v293_v39  ;;  %v337_v42 = vsel %vm323_vm1, %v2547_v55, %v297_v37  ;;  %v361_v48 = vpop.permute.xlu2 %360 }
  0xa9   : > { %344 = vst [vmem:[#allocation2] sm:$0xf] %v336_v40  ;;  %v338_v43 = vsel %vm325_vm2, %v337_v42, %v301_v23  ;;  %v448_v19 = vrot.slane %v361_v48, 4 }
  0xaf   : > { %v309_v44 = vpop.permute.xlu1 %308  ;;  %v305_v45 = vpop.permute.xlu0 %304 }
  0xb0   : > { %v339_v46 = vsel %vm327_vm3, %v338_v43, %v305_v45  ;;  %v367_v54 = vpop.permute.xlu2 %366 }
  0xb1   : > { %v340_v47 = vsel %vm329_vm4, %v339_v46, %v309_v44  ;;  %v390_v61 = vrot.slane %v367_v54, 4 }
  0xb2   : > { %v341_v50 = vsel %vm331_vm5, %v340_v47, %v313_v32 }
  0xb7   : > { %v321_v49 = vpop.permute.xlu1 %320  ;;  %v317_v51 = vpop.permute.xlu0 %316 }
  0xb8   : > { %v342_v52 = vsel %vm333_vm6, %v341_v50, %v317_v51  ;;  %v573_v47 = vpop.permute.xlu2 %572 }
  0xb9   : > { %v343_v53 = vsel %vm335_vm7, %v342_v52, %v321_v49 }
  0xba   : > { %345 = vst [vmem:[#allocation2 + $0x8] sm:$0xf] %v343_v53 }
  0xbf   : > { %v359_v55 = vpop.permute.xlu1 %358  ;;  %v357_v56 = vpop.permute.xlu0 %356 }
  0xc0   : > { %v392_v57 = vrot.slane %v359_v55, 4  ;;  %v436_v62 = vrot.slane %v357_v56, 4  ;;  %v391_v10 = vsel %vm155_vm0, %v390_v61, %v359_v55  ;;  %v2686_v55 = vpop.permute.xlu2 %578  ;;  %v606_v61 = vrot.slane %v573_v47, 4 }
  0xc1   : > { %v2635_v20 = vperm.slane %v391_v10, %v2481_v5 }
  0xc2   : > { %v393_v58 = vsel %vm155_vm0, %v367_v54, %v392_v57  ;;  %v648_v57 = vrot.slane %v2686_v55, 4 }
  0xc3   : > { %v401_v60 = vperm.slane %v393_v58, %v2481_v5 }
  0xc5   : > { %v414_v1 = vrot.slane %v401_v60, 4 }
  0xc7   : > { %v365_v63 = vpop.permute.xlu1 %364  ;;  %v363_v0 = vpop.permute.xlu0 %362 }
  0xc8   : > { %v434_v7 = vrot.slane %v365_v63, 4  ;;  %v378_v8 = vrot.slane %v363_v0, 4  ;;  %v381_v9 = vsel %vm155_vm0, %v363_v0, %v380_v59  ;;  %v437_v12 = vsel %vm155_vm0, %v365_v63, %v436_v62 }
  0xc9   : > { %v389_v11 = vperm.slane %v381_v9, %v2481_v5  ;;  %v445_v23 = vperm.slane %v437_v12, %v2481_v5 }
  0xca   : > { %v379_v15 = vsel %vm155_vm0, %v378_v8, %v355_v41  ;;  %v435_v21 = vsel %vm155_vm0, %v434_v7, %v357_v56 }
  0xcb   : > { %v2632_v16 = vperm.slane %v379_v15, %v2481_v5  ;;  %v416_v17 = vrot.slane %v389_v11, 4  ;;  %v415_v22 = vsel %vm155_vm0, %v414_v1, %v389_v11  ;;  %v2649_v30 = vperm.slane %v435_v21, %v2481_v5 }
  0xcc   : > { %v2641_v26 = vperm.slane %v415_v22, %v2514_v25  ;;  %v472_v37 = vrot.slane %v445_v23, 4 }
  0xcd   : > { %v417_v27 = vsel %vm155_vm0, %v401_v60, %v416_v17  ;;  %v404_v28 = vrot.slane %v2632_v16, 4  ;;  %v460_v43 = vrot.slane %v2649_v30, 4 }
  0xce   : > { %v2646_v29 = vperm.slane %v417_v27, %v2514_v25  ;;  %503 = vrot.lane.b32.xlu1 %v2641_v26, %s2391_s26 }
  0xcf   : > { %v2653_v31 = vpop.permute.xlu1 %570  ;;  %v369_v32 = vpop.permute.xlu0 %368  ;;  %v405_v33 = vsel %vm155_vm0, %v2635_v20, %v404_v28 }
  0xd0   : > { %v446_v34 = vrot.slane %v369_v32, 4  ;;  %v449_v35 = vsel %vm155_vm0, %v369_v32, %v448_v19  ;;  %511 = vrot.lane.b32.xlu0 %v2646_v29, %s2393_s28  ;;  %v2661_v36 = vperm.slane %v405_v33, %v2514_v25  ;;  %v649_v0 = vsel %vm155_vm0, %v648_v57, %v2653_v31 }
  0xd1   : > { %v457_v38 = vperm.slane %v449_v35, %v2481_v5  ;;  %v655_v11 = vperm.slane %v649_v0, %v2481_v5  ;;  %v402_v33 = vrot.slane %v2635_v20, 4  ;;  %v432_v57 = vrot.slane %v2646_v29, 4 }
  0xd2   : > { %v447_v39 = vsel %vm155_vm0, %v446_v34, %v361_v48  ;;  %495 = vrot.lane.b32.xlu2 %v2661_v36, %s2392_s27  ;;  %v650_v0 = vrot.slane %v2653_v31, 4 }
  0xd3   : > { %v453_v40 = vperm.slane %v447_v39, %v2481_v5  ;;  %v470_v41 = vrot.slane %v457_v38, 4  ;;  %v473_v42 = vsel %vm155_vm0, %v457_v38, %v472_v37  ;;  %v674_v37 = vrot.slane %v655_v11, 4 }
  0xd4   : > { %v2671_v44 = vperm.slane %v473_v42, %v2514_v25  ;;  %v403_v20 = vsel %vm155_vm0, %v402_v33, %v2632_v16  ;;  %v428_v42 = vrot.slane %v2661_v36, 4  ;;  %v651_v31 = vsel %vm155_vm0, %v2686_v55, %v650_v0 }
  0xd5   : > { %v461_v45 = vsel %vm155_vm0, %v453_v40, %v460_v43  ;;  %v471_v46 = vsel %vm155_vm0, %v470_v41, %v445_v23  ;;  %v458_v38 = vrot.slane %v453_v40, 4  ;;  %v430_v41 = vrot.slane %v2641_v26, 4 }
  0xd6   : > { %v2676_v48 = vperm.slane %v461_v45, %v2514_v25  ;;  %539 = vrot.lane.b32.xlu1 %v2671_v44, %s2393_s28  ;;  %v477_v50 = vperm.slane %v471_v46, %v2514_v25  ;;  %v2733_v45 = vperm.slane %v403_v20, %v2514_v25  ;;  %v429_v16 = vsel %vm155_vm0, 0.0, %v428_v42 }
  0xd7   : > { %v569_v49 = vpop.permute.xlu0 %568  ;;  %v577_v51 = vpop.permute.xlu1 %576  ;;  %v459_v40 = vsel %vm155_vm0, %v458_v38, %v2649_v30  ;;  %v431_v46 = vsel %vm155_vm0, 0.0, %v430_v41  ;;  %v1428_v38 = vrot.slane %v2512_v24, 2  ;;  %v797_v0 = vrot.slane %v2494_v14, 1 }
  0xd8   : > { %523 = vrot.lane.b32.xlu0 %v2676_v48, %s2392_s27  ;;  %v594_v52 = vrot.slane %v569_v49, 4  ;;  %v592_v54 = vrot.slane %v577_v51, 4  ;;  %v2740_v26 = vperm.slane %v459_v40, %v2514_v25  ;;  %v426_v36 = vrot.slane %v2733_v45, 4 }
  0xda   : > { %531 = vrot.lane.b32.xlu2 %v477_v50, %s2391_s26  ;;  %v595_v56 = vsel %vm155_vm0, %v577_v51, %v594_v52  ;;  %v593_v59 = vsel %vm155_vm0, %v592_v54, %v569_v49  ;;  %v482_v30 = vrot.slane %v2740_v26, 4  ;;  %v427_v49 = vsel %vm155_vm0, 0.0, %v426_v36 }
  0xdb   : > { %v603_v60 = vperm.slane %v595_v56, %v2481_v5  ;;  %v599_v63 = vperm.slane %v593_v59, %v2481_v5  ;;  %v488_v59 = vrot.slane %v2671_v44, 4 }
  0xdc   : > { %v483_v51 = vsel %vm155_vm0, 0.0, %v482_v30 }
  0xdd   : > { %v630_v10 = vrot.slane %v603_v60, 4  ;;  %v618_v17 = vrot.slane %v599_v63, 4 }
  0xdf   : > { %v2684_v53 = vpop.permute.xlu0 %574  ;;  %v2690_v58 = vpop.permute.xlu1 %582 }
  0xe0   : > { %v660_v62 = vrot.slane %v2690_v58, 4 }
  0xe2   : > { %v661_v12 = vsel %vm155_vm0, %v660_v62, %v2684_v53 }
  0xe3   : > { %v667_v27 = vperm.slane %v661_v12, %v2481_v5 }
  0xe5   : > { %v675_v39 = vsel %vm155_vm0, %v667_v27, %v674_v37  ;;  %v672_v54 = vrot.slane %v667_v27, 4  ;;  %v1427_v37 = vrot.slane %v2476_v3, 2 }
  0xe6   : > { %v2728_v43 = vperm.slane %v675_v39, %v2514_v25 }
  0xe7   : > { %v581_v1 = vpop.permute.xlu0 %580 }
  0xe8   : > { %v604_v7 = vrot.slane %v581_v1, 4  ;;  %v607_v8 = vsel %vm155_vm0, %v581_v1, %v606_v61  ;;  %v673_v61 = vsel %vm155_vm0, %v672_v54, %v655_v11  ;;  %v433_v1 = vsel %vm155_vm0, 0.0, %v432_v57 }
  0xe9   : > { %v615_v9 = vperm.slane %v607_v8, %v2481_v5  ;;  %v659_v11 = vperm.slane %v651_v31, %v2481_v5 }
  0xea   : > { %v605_v15 = vsel %vm155_vm0, %v604_v7, %v573_v47  ;;  %v486_v47 = vrot.slane %v477_v50, 4  ;;  %v662_v50 = vrot.slane %v2684_v53, 4  ;;  %v489_v7 = vsel %vm155_vm0, 0.0, %v488_v59  ;;  %v147_v59 = vld [vmem:[%s2470_s25 + $0x28] sm:$0x3] }
  0xeb   : > { %v611_v19 = vperm.slane %v605_v15, %v2481_v5  ;;  %v628_v21 = vrot.slane %v615_v9, 4  ;;  %v631_v22 = vsel %vm155_vm0, %v615_v9, %v630_v10  ;;  %v2765_v53 = vperm.slane %v673_v61, %v2514_v25 }
  0xec   : > { %v2707_v23 = vperm.slane %v631_v22, %v2514_v25  ;;  %v487_v52 = vsel %vm155_vm0, 0.0, %v486_v47  ;;  %v663_v29 = vsel %vm155_vm0, %v2690_v58, %v662_v50  ;;  %v698_v47 = vrot.slane %v2728_v43, 4 }
  0xed   : > { %v629_v28 = vsel %vm155_vm0, %v628_v21, %v603_v60  ;;  %v619_v32 = vsel %vm155_vm0, %v611_v19, %v618_v17  ;;  %v616_v56 = vrot.slane %v611_v19, 4  ;;  %v671_v9 = vperm.slane %v663_v29, %v2481_v5 }
  0xee   : > { %725 = vrot.lane.b32.xlu1 %v2707_v23, %s2393_s28  ;;  %v635_v34 = vperm.slane %v629_v28, %v2514_v25  ;;  %v2717_v35 = vperm.slane %v619_v32, %v2514_v25  ;;  %v696_v58 = vrot.slane %v2765_v53, 4  ;;  %v1437_v17 = vrot.slane %v2484_v6, 2 }
  0xef   : > { %v617_v62 = vsel %vm155_vm0, %v616_v56, %v599_v63  ;;  %v484_v63 = vrot.slane %v2676_v48, 4  ;;  %v684_v15 = vrot.slane %v671_v9, 4  ;;  %v1438_v19 = vrot.slane %v2494_v14, 2 }
  0xf0   : > { %717 = vrot.lane.b32.xlu2 %v635_v34, %s2391_s26  ;;  %709 = vrot.lane.b32.xlu0 %v2717_v35, %s2392_s27  ;;  %v644_v60 = vrot.slane %v635_v34, 4  ;;  %v2768_v8 = vperm.slane %v617_v62, %v2514_v25  ;;  %v697_v55 = vsel %vm155_vm0, 0.0, %v696_v58  ;;  %v686_v21 = vrot.slane %v659_v11, 4 }
  0xf1   : > { %v485_v12 = vsel %vm155_vm0, 0.0, %v484_v63  ;;  %v642_v22 = vrot.slane %v2717_v35, 4  ;;  %v685_v27 = vsel %vm155_vm0, %v684_v15, %v659_v11  ;;  %v1439_v28 = vsel %vm1421_vm8, %v1437_v17, %v1438_v19 }
  0xf2   : > { %v645_v44 = vsel %vm155_vm0, 0.0, %v644_v60  ;;  %v640_v10 = vrot.slane %v2768_v8, 4  ;;  %v646_v32 = vrot.slane %v2707_v23, 4  ;;  %v1462_v33 = vrot.slane %v1439_v28, 4 }
  0xf3   : > { %v687_v34 = vsel %vm155_vm0, %v671_v9, %v686_v21  ;;  %v643_v39 = vsel %vm155_vm0, 0.0, %v642_v22  ;;  %v691_v20 = vperm.slane %v685_v27, %v2514_v25  ;;  %v2798_v35 = vsel %vm1421_vm8, %v1427_v37, %v1428_v38 }
  0xf4   : > { %v641_v48 = vsel %vm155_vm0, 0.0, %v640_v10  ;;  %v647_v41 = vsel %vm155_vm0, 0.0, %v646_v32  ;;  %v695_v23 = vperm.slane %v687_v34, %v2514_v25  ;;  %v2804_v42 = vsel %vm155_vm0, %v1462_v33, %v2798_v35 }
  0xf5   : > { %v1464_v40 = vrot.slane %v2798_v35, 4  ;;  %v699_v54 = vsel %vm155_vm0, 0.0, %v698_v47  ;;  %v1430_v50 = vrot.slane %v147_v59, 2  ;;  %v789_v31 = vrot.slane %v147_v59, 1 }
  0xf6   : > { %737 = vrot.lane.b32.xlu1 %v2728_v43, %s2392_s27  ;;  %v702_v30 = vrot.slane %v695_v23, 4  ;;  %v1432_v63 = vrot.slane %v2479_v4, 2  ;;  %v1433_v14 = vrot.slane %v2491_v13, 2  ;;  %v796_v58 = vrot.slane %v2484_v6, 1 }
  0xf7   : > { %v2811_v36 = vsel %vm155_vm0, %v1439_v28, %v1464_v40  ;;  %v1431_v43 = vsel %vm1421_vm8, %v1428_v38, %v1430_v50  ;;  %v791_v34 = vrot.slane %v2479_v4, 1  ;;  %v792_v37 = vrot.slane %v2491_v13, 1 }
  0xf8   : > { %507 = vrot.lane.b32.xlu2 %v431_v46, %s2397_s4  ;;  %499 = vrot.lane.b32.xlu0 %v429_v16, %s2394_s29  ;;  %v700_v46 = vrot.slane %v691_v20, 4  ;;  %v153_v16 = vld [vmem:[%s2470_s25 + $0x58] sm:$0x3]  ;;  %v1520_v61 = vrot.slane %v1431_v43, 4  ;;  %v2854_v15 = vsel %vm1421_vm8, %v1432_v63, %v1433_v14  ;;  %v798_v17 = vsel %vm780_vm9, %v796_v58, %v797_v0 }
  0xfe   : > { %491 = vrot.lane.b32.xlu1 %v427_v49, %s2395_s30  ;;  %v1440_v49 = vrot.slane %v153_v16, 2 }
 0x100   : > { %519 = vrot.lane.b32.xlu2 %v483_v51, %s2395_s30  ;;  %535 = vrot.lane.b32.xlu0 %v487_v52, %s2397_s4  ;;  %v701_v51 = vsel %vm155_vm0, 0.0, %v700_v46  ;;  %v703_v52 = vsel %vm155_vm0, 0.0, %v702_v30  ;;  %v1441_v56 = vsel %vm1421_vm8, %v1438_v19, %v1440_v49  ;;  %v821_v19 = vrot.slane %v798_v17, 4  ;;  %v144_v46 = vld [vmem:[%s2470_s25 + $0x10] sm:$0x3] }
 0x101   : > { %v1518_v57 = vrot.slane %v1441_v56, 4  ;;  %v2828_v62 = vsel %vm155_vm0, %v1441_v56, %v1520_v61  ;;  %v782_v30 = vrot.slane %v2503_v18, 1  ;;  %v784_v47 = vrot.slane %v144_v46, 1 }
 0x102   : > { %v781_v49 = vrot.slane %v2473_v2, 1  ;;  %v1425_v50 = vrot.slane %v144_v46, 2 }
 0x103   : > { %v2824_v60 = vsel %vm155_vm0, %v1518_v57, %v1431_v43 }
 0x106   : > { %515 = vrot.lane.b32.xlu1 %v433_v1, %s2396_s3  ;;  %v799_v1 = vrot.slane %v153_v16, 1 }
 0x108   : > { %543 = vrot.lane.b32.xlu2 %v489_v7, %s2396_s3  ;;  %721 = vrot.lane.b32.xlu0 %v645_v44, %s2397_s4  ;;  %v800_v7 = vsel %vm780_vm9, %v797_v0, %v799_v1  ;;  %v787_v44 = vrot.slane %v2512_v24, 1 }
 0x109   : > { %v877_v29 = vrot.slane %v800_v7, 4 }
 0x10a   : > { %v2840_v9 = vsel %vm780_vm9, %v787_v44, %v789_v31 }
 0x10b   : > { %v2846_v10 = vsel %vm155_vm0, %v877_v29, %v2840_v9  ;;  %v879_v24 = vrot.slane %v2840_v9, 4 }
 0x10d   : > { %v2850_v11 = vsel %vm155_vm0, %v800_v7, %v879_v24 }
 0x10e   : > { %527 = vrot.lane.b32.xlu1 %v485_v12, %s2394_s29  ;;  %3898 = vst [vmem:[#allocation6_spill] sm:$0xff] %v2850_v11  ;;  %v150_v12 = vld [vmem:[%s2470_s25 + $0x40] sm:$0x3]  ;;  %s2190_s25 = sshll.u32 %s136_s24, 4  ;;  %s2191_s25 = int_to_ptr.vmem [resolvable:$true] %s2190_s25 }
 0x10f   : > { %v1435_v6 = vrot.slane %v150_v12, 2  ;;  %v794_v38 = vrot.slane %v150_v12, 1 }
 0x110   : > { %733 = vrot.lane.b32.xlu0 %v697_v55, %s2395_s30  ;;  %705 = vrot.lane.b32.xlu2 %v641_v48, %s2395_s30  ;;  %v786_v48 = vrot.slane %v2476_v3, 1 }
 0x111   : > { %v2867_v22 = vsel %vm1421_vm8, %v1433_v14, %v1435_v6  ;;  %v795_v4 = vsel %vm780_vm9, %v792_v37, %v794_v38 }
 0x112   : > { %v788_v21 = vsel %vm780_vm9, %v786_v48, %v787_v44  ;;  %v865_v16 = vrot.slane %v795_v4, 4 }
 0x113   : > { %v2870_v27 = vsel %vm155_vm0, %v821_v19, %v788_v21 }
 0x116   : > { %713 = vrot.lane.b32.xlu1 %v643_v39, %s2394_s29 }
 0x118   : > { %745 = vrot.lane.b32.xlu0 %v691_v20, %s2391_s26  ;;  %729 = vrot.lane.b32.xlu2 %v647_v41, %s2396_s3  ;;  %v1422_v41 = vrot.slane %v2473_v2, 2 }
 0x11e   : > { %749 = vrot.lane.b32.xlu1 %v701_v51, %s2397_s4 }
 0x120   : > { %757 = vrot.lane.b32.xlu0 %v703_v52, %s2396_s3  ;;  %741 = vrot.lane.b32.xlu2 %v699_v54, %s2394_s29  ;;  %v785_v52 = vsel %vm780_vm9, %v782_v30, %v784_v47  ;;  %v783_v54 = vsel %vm780_vm9, %v781_v49, %v782_v30 }
 0x121   : > { %v867_v57 = vrot.slane %v785_v52, 4 }
 0x123   : > { %v2918_v2 = vsel %vm155_vm0, %v795_v4, %v867_v57 }
 0x124   : > { %3899 = vst [vmem:[#allocation7_spill] sm:$0xff] %v2918_v2 }
 0x126   : > { %1646 = vrot.lane.b32.xlu1 %v1439_v28, %s2398_s5 }
 0x128   : > { %1860 = vrot.lane.b32.xlu0 %v1439_v28, %s2399_s6  ;;  %753 = vrot.lane.b32.xlu2 %v695_v23, %s2393_s28  ;;  %v823_v28 = vrot.slane %v788_v21, 4  ;;  %v1423_v23 = vrot.slane %v2503_v18, 2  ;;  %v811_v18 = vrot.slane %v783_v54, 4 }
 0x12a   : > { %v2873_v32 = vsel %vm155_vm0, %v798_v17, %v823_v28  ;;  %v2903_v51 = vsel %vm1421_vm8, %v1422_v41, %v1423_v23 }
 0x12c   : > { %v2859_v55 = vpop.permute.xlu2 %495 }
 0x12e   : > { %1862 = vrot.lane.b32.xlu1 %v1441_v56, %s2399_s6 }
 0x130   : > { %1221 = vrot.lane.b32.xlu0 %v800_v7, %s2399_s6  ;;  %1648 = vrot.lane.b32.xlu2 %v1441_v56, %s2398_s5  ;;  %v2909_v56 = vsel %vm155_vm0, %v865_v16, %v785_v52 }
 0x134   : > { %v2879_v3 = vpop.permute.xlu2 %531 }
 0x136   : > { %1638 = vrot.lane.b32.xlu1 %v2798_v35, %s2398_s5 }
 0x138   : > { %1642 = vrot.lane.b32.xlu0 %v2854_v15, %s2398_s5  ;;  %1219 = vrot.lane.b32.xlu2 %v798_v17, %s2399_s6 }
 0x13e   : > { %1644 = vrot.lane.b32.xlu1 %v2867_v22, %s2398_s5 }
 0x140   : > { %1854 = vrot.lane.b32.xlu0 %v1431_v43, %s2399_s6  ;;  %1640 = vrot.lane.b32.xlu2 %v1431_v43, %s2398_s5  ;;  %v504_v39 = vpop.permute.xlu1 %503 }
 0x142   : > { %v512_v20 = vpop.permute.xlu0 %511 }
 0x146   : > { %1856 = vrot.lane.b32.xlu1 %v2854_v15, %s2399_s6 }
 0x148   : > { %1011 = vrot.lane.b32.xlu0 %v798_v17, %s2398_s5  ;;  %1852 = vrot.lane.b32.xlu2 %v2798_v35, %s2399_s6  ;;  %v793_v35 = vsel %vm780_vm9, %v791_v34, %v792_v37  ;;  %v540_v43 = vpop.permute.xlu1 %539 }
 0x149   : > { %v809_v40 = vrot.slane %v793_v35, 4  ;;  %v2921_v61 = vsel %vm155_vm0, %v793_v35, %v811_v18 }
 0x14a   : > { %v2886_v33 = vpop.permute.xlu2 %717  ;;  %3900 = vst [vmem:[#allocation8_spill] sm:$0xff] %v2921_v61  ;;  %v524_v0 = vpop.permute.xlu0 %523 }
 0x14b   : > { %v2912_v59 = vsel %vm155_vm0, %v809_v40, %v783_v54 }
 0x14e   : > { %1013 = vrot.lane.b32.xlu1 %v800_v7, %s2398_s5  ;;  %v2924_v7 = vsel %vm1421_vm8, %v1423_v23, %v1425_v50 }
 0x150   : > { %1213 = vrot.lane.b32.xlu0 %v2840_v9, %s2399_s6  ;;  %1858 = vrot.lane.b32.xlu2 %v2867_v22, %s2399_s6 }
 0x152   : > { %v508_v13 = vpop.permute.xlu2 %507 }
 0x156   : > { %1215 = vrot.lane.b32.xlu1 %v793_v35, %s2399_s6 }
 0x158   : > { %1634 = vrot.lane.b32.xlu0 %v2903_v51, %s2398_s5  ;;  %1211 = vrot.lane.b32.xlu2 %v788_v21, %s2399_s6 }
 0x15a   : > { %v520_v1 = vpop.permute.xlu2 %519 }
 0x15e   : > { %1636 = vrot.lane.b32.xlu1 %v2924_v7, %s2398_s5 }
 0x160   : > { %v726_v29 = vpop.permute.xlu1 %725  ;;  %1850 = vrot.lane.b32.xlu0 %v2924_v7, %s2399_s6  ;;  %1217 = vrot.lane.b32.xlu2 %v795_v4, %s2399_s6 }
 0x162   : > { %v544_v44 = vpop.permute.xlu2 %543  ;;  %v710_v31 = vpop.permute.xlu0 %709 }
 0x166   : > { %1003 = vrot.lane.b32.xlu1 %v788_v21, %s2398_s5 }
 0x168   : > { %v738_v63 = vpop.permute.xlu1 %737  ;;  %1007 = vrot.lane.b32.xlu0 %v793_v35, %s2398_s5  ;;  %1848 = vrot.lane.b32.xlu2 %v2903_v51, %s2399_s6  ;;  %v553_v35 = vsel %vm323_vm1, %v2740_v26, %v520_v1 }
 0x16a   : > { %v706_v14 = vpop.permute.xlu2 %705  ;;  %v500_v58 = vpop.permute.xlu0 %499 }
 0x16b   : > { %v760_v16 = vsel %vm323_vm1, %v2768_v8, %v706_v14 }
 0x16c   : > { %v761_v49 = vsel %vm325_vm2, %v760_v16, %v710_v31 }
 0x16e   : > { %1009 = vrot.lane.b32.xlu1 %v795_v4, %s2398_s5 }
 0x170   : > { %v492_v24 = vpop.permute.xlu1 %491  ;;  %1209 = vrot.lane.b32.xlu0 %v785_v52, %s2399_s6  ;;  %1005 = vrot.lane.b32.xlu2 %v2840_v9, %s2398_s5 }
 0x171   : > { %v546_v12 = vsel %vm323_vm1, %v2733_v45, %v492_v24 }
 0x172   : > { %v547_v17 = vsel %vm325_vm2, %v546_v12, %v2859_v55  ;;  %v730_v19 = vpop.permute.xlu2 %729  ;;  %v536_v6 = vpop.permute.xlu0 %535 }
 0x173   : > { %v548_v48 = vsel %vm327_vm3, %v547_v17, %v500_v58 }
 0x174   : > { %v549_v21 = vsel %vm329_vm4, %v548_v48, %v504_v39  ;;  %v554_v39 = vsel %vm325_vm2, %v553_v35, %v524_v0 }
 0x175   : > { %v550_v28 = vsel %vm331_vm5, %v549_v21, %v508_v13 }
 0x176   : > { %999 = vrot.lane.b32.xlu1 %v783_v54, %s2398_s5  ;;  %v551_v37 = vsel %vm333_vm6, %v550_v28, %v512_v20 }
 0x178   : > { %v516_v34 = vpop.permute.xlu1 %515  ;;  %1207 = vrot.lane.b32.xlu2 %v783_v54, %s2399_s6 }
 0x179   : > { %v552_v45 = vsel %vm335_vm7, %v551_v37, %v516_v34 }
 0x17a   : > { %v562_v9 = vrot.slane %v552_v45, 4  ;;  %v742_v38 = vpop.permute.xlu2 %741  ;;  %v722_v55 = vpop.permute.xlu0 %721 }
 0x17c   : > { %566 = vst [vmem:[#allocation2] sm:$0xf0] %v562_v9 }
 0x180   : > { %v528_v41 = vpop.permute.xlu1 %527  ;;  %1001 = vrot.lane.b32.xlu2 %v785_v52, %s2398_s5 }
 0x181   : > { %v555_v23 = vsel %vm327_vm3, %v554_v39, %v528_v41 }
 0x182   : > { %v556_v20 = vsel %vm329_vm4, %v555_v23, %v2879_v3  ;;  %v754_v4 = vpop.permute.xlu2 %753  ;;  %v734_v13 = vpop.permute.xlu0 %733 }
 0x183   : > { %v557_v40 = vsel %vm331_vm5, %v556_v20, %v536_v6  ;;  %v767_v52 = vsel %vm323_vm1, %v2765_v53, %v734_v13 }
 0x184   : > { %v558_v46 = vsel %vm333_vm6, %v557_v40, %v540_v43  ;;  %v768_v50 = vsel %vm325_vm2, %v767_v52, %v738_v63 }
 0x185   : > { %v559_v26 = vsel %vm335_vm7, %v558_v46, %v544_v44  ;;  %v769_v1 = vsel %vm327_vm3, %v768_v50, %v742_v38 }
 0x186   : > { %v563_v30 = vrot.slane %v559_v26, 4 }
 0x188   : > { %567 = vst [vmem:[#allocation2 + $0x8] sm:$0xf0] %v563_v30  ;;  %v714_v47 = vpop.permute.xlu1 %713  ;;  %v1506_v30 = vrot.slane %v2867_v22, 4 }
 0x189   : > { %v762_v3 = vsel %vm327_vm3, %v761_v49, %v714_v47 }
 0x18a   : > { %v763_v54 = vsel %vm329_vm4, %v762_v3, %v2886_v33  ;;  %v2968_v57 = vpop.permute.xlu2 %1648  ;;  %v746_v18 = vpop.permute.xlu0 %745 }
 0x18b   : > { %v764_v8 = vsel %vm331_vm5, %v763_v54, %v722_v55  ;;  %v770_v53 = vsel %vm329_vm4, %v769_v1, %v746_v18  ;;  %v3027_v54 = vperm.slane %v2824_v60, %v2481_v5  ;;  %v1507_v18 = vsel %vm155_vm0, %v1506_v30, %v2924_v7 }
 0x18c   : > { %v765_v43 = vsel %vm333_vm6, %v764_v8, %v726_v29 }
 0x18d   : > { %v766_v0 = vsel %vm335_vm7, %v765_v43, %v730_v19 }
 0x18e   : > { %774 = vst [vmem:[#allocation2 + $0x10] sm:$0xf] %v766_v0 }
 0x190   : > { %v750_v44 = vpop.permute.xlu1 %749 }
 0x191   : > { %v771_v31 = vsel %vm331_vm5, %v770_v53, %v750_v44 }
 0x192   : > { %v2977_v33 = vpop.permute.xlu2 %1219  ;;  %v772_v14 = vsel %vm333_vm6, %v771_v31, %v754_v4  ;;  %v758_v58 = vpop.permute.xlu0 %757 }
 0x193   : > { %v773_v24 = vsel %vm335_vm7, %v772_v14, %v758_v58 }
 0x194   : > { %775 = vst [vmem:[#allocation2 + $0x18] sm:$0xf] %v773_v24  ;;  %v1530_v24 = vrot.slane %v3027_v54, 4 }
 0x198   : > { %v1647_v63 = vpop.permute.xlu1 %1646 }
 0x199   : > { %v1670_v44 = vrot.slane %v1647_v63, 4 }
 0x19a   : > { %v2981_v29 = vpop.permute.xlu2 %1640  ;;  %v1861_v12 = vpop.permute.xlu0 %1860 }
 0x19b   : > { %v1728_v17 = vrot.slane %v2981_v29, 4  ;;  %v1884_v46 = vrot.slane %v1861_v12, 4 }
 0x19d   : > { %v2986_v19 = vsel %vm155_vm0, %v2968_v57, %v1728_v17 }
 0x1a0   : > { %v2988_v6 = vpop.permute.xlu1 %1862 }
 0x1a2   : > { %v1853_v48 = vpop.permute.xlu2 %1852  ;;  %v2990_v21 = vpop.permute.xlu0 %1221 }
 0x1a3   : > { %v1886_v28 = vrot.slane %v1853_v48, 4  ;;  %v1885_v47 = vsel %vm155_vm0, %v1884_v46, %v1853_v48  ;;  %v1450_v48 = vrot.slane %v2854_v15, 4 }
 0x1a4   : > { %v3023_v52 = vperm.slane %v1885_v47, %v2481_v5 }
 0x1a5   : > { %v1887_v34 = vsel %vm155_vm0, %v1861_v12, %v1886_v28  ;;  %v3047_v12 = vperm.slane %v1507_v18, %v2481_v5  ;;  %v1243_v18 = vrot.slane %v2977_v33, 4 }
 0x1a6   : > { %v1895_v43 = vperm.slane %v1887_v34, %v2481_v5  ;;  %v1896_v60 = vrot.slane %v3023_v52, 4 }
 0x1a8   : > { %v1639_v37 = vpop.permute.xlu1 %1638  ;;  %v1908_v28 = vrot.slane %v1895_v43, 4 }
 0x1a9   : > { %v1672_v45 = vrot.slane %v1639_v37, 4  ;;  %v1671_v17 = vsel %vm155_vm0, %v1670_v44, %v1639_v37 }
 0x1aa   : > { %v2993_v9 = vpop.permute.xlu2 %1858  ;;  %v2995_v38 = vpop.permute.xlu0 %1642  ;;  %v3063_v37 = vperm.slane %v1671_v17, %v2481_v5 }
 0x1ab   : > { %v2998_v55 = vsel %vm155_vm0, %v1647_v63, %v1672_v45  ;;  %v3056_v45 = vperm.slane %v2804_v42, %v2481_v5  ;;  %v1658_v30 = vrot.slane %v2995_v38, 4 }
 0x1b0   : > { %v3000_v35 = vpop.permute.xlu1 %1644 }
 0x1b2   : > { %v3002_v41 = vpop.permute.xlu2 %1211  ;;  %v3004_v39 = vpop.permute.xlu0 %1854 }
 0x1b3   : > { %v1245_v23 = vrot.slane %v3002_v41, 4  ;;  %v1942_v20 = vrot.slane %v3004_v39, 4 }
 0x1b5   : > { %v3010_v4 = vsel %vm155_vm0, %v2977_v33, %v1245_v23  ;;  %v3014_v13 = vsel %vm155_vm0, %v2988_v6, %v1942_v20  ;;  %v1726_v23 = vrot.slane %v2968_v57, 4 }
 0x1b8   : > { %v1857_v40 = vpop.permute.xlu1 %1856 }
 0x1b9   : > { %v1872_v3 = vrot.slane %v1857_v40, 4 }
 0x1ba   : > { %v3016_v16 = vpop.permute.xlu2 %1217  ;;  %v3018_v26 = vpop.permute.xlu0 %1011 }
 0x1c0   : > { %v1014_v49 = vpop.permute.xlu1 %1013 }
 0x1c1   : > { %v1091_v47 = vrot.slane %v1014_v49, 4 }
 0x1c2   : > { %v1849_v8 = vpop.permute.xlu2 %1848  ;;  %v3031_v50 = vpop.permute.xlu0 %1213 }
 0x1c3   : > { %v1873_v0 = vsel %vm155_vm0, %v1872_v3, %v1849_v8  ;;  %v1874_v1 = vrot.slane %v1849_v8, 4  ;;  %v1301_v53 = vrot.slane %v3031_v50, 4 }
 0x1c4   : > { %v3037_v31 = vperm.slane %v1873_v0, %v2481_v5  ;;  %v3075_v0 = vsel %vm155_vm0, %v1530_v24, %v3047_v12 }
 0x1c5   : > { %v1875_v14 = vsel %vm155_vm0, %v1857_v40, %v1874_v1  ;;  %v3043_v58 = vsel %vm155_vm0, %v2990_v21, %v1301_v53  ;;  %v1451_v53 = vsel %vm155_vm0, %v1450_v48, %v2903_v51 }
 0x1c6   : > { %v1883_v63 = vperm.slane %v1875_v14, %v2481_v5  ;;  %v1897_v34 = vsel %vm155_vm0, %v1896_v60, %v3037_v31  ;;  %v1727_v14 = vsel %vm155_vm0, %v1726_v23, %v2981_v29  ;;  %v1244_v29 = vsel %vm155_vm0, %v1243_v18, %v3002_v41 }
 0x1c7   : > { %v3060_v46 = vperm.slane %v1897_v34, %v2514_v25  ;;  %v3099_v34 = vperm.slane %v1451_v53, %v2481_v5  ;;  %v1733_v23 = vperm.slane %v1727_v14, %v2481_v5 }
 0x1c8   : > { %v1910_v20 = vrot.slane %v1883_v63, 4  ;;  %v1216_v40 = vpop.permute.xlu1 %1215  ;;  %v3067_v3 = vsel %vm155_vm0, %v1908_v28, %v1883_v63  ;;  %v1682_v63 = vrot.slane %v3063_v37, 4  ;;  %v1474_v28 = vrot.slane %v3056_v45, 4 }
 0x1c9   : > { %3901 = vst [vmem:[#allocation9_spill] sm:$0xff] %v3060_v46  ;;  %v1920_v57 = vrot.slane %v3060_v46, 4  ;;  %v1231_v41 = vrot.slane %v1216_v40, 4 }
 0x1ca   : > { %v1006_v42 = vpop.permute.xlu2 %1005  ;;  %v3070_v8 = vpop.permute.xlu0 %1634  ;;  %v3078_v1 = vsel %vm155_vm0, %v1895_v43, %v1910_v20  ;;  %v1940_v43 = vrot.slane %v2988_v6, 4  ;;  %v1714_v20 = vrot.slane %v3000_v35, 4 }
 0x1cb   : > { %v3083_v44 = vsel %vm155_vm0, %v1091_v47, %v1006_v42  ;;  %v1093_v60 = vrot.slane %v1006_v42, 4  ;;  %v1659_v33 = vsel %vm155_vm0, %v1658_v30, %v3070_v8  ;;  %v1921_v24 = vsel %vm155_vm0, 0.0, %v1920_v57 }
 0x1cc   : > { %v3090_v17 = vperm.slane %v1659_v33, %v2481_v5  ;;  %1985 = vrot.lane.b32.xlu2 %v1921_v24, %s2395_s30  ;;  %v1941_v6 = vsel %vm155_vm0, %v1940_v43, %v3004_v39  ;;  %v1928_v42 = vrot.slane %v2993_v9, 4  ;;  %v3116_v57 = vperm.slane %v1244_v29, %v2481_v5 }
 0x1cd   : > { %v1094_v48 = vsel %vm155_vm0, %v1014_v49, %v1093_v60  ;;  %v3121_v53 = vperm.slane %v1941_v6, %v2481_v5  ;;  %v3127_v24 = vsel %vm155_vm0, %v1474_v28, %v3099_v34  ;;  %v1738_v43 = vrot.slane %v1733_v23, 4 }
 0x1ce   : > { %v1683_v49 = vsel %vm155_vm0, %v1682_v63, %v3090_v17 }
 0x1cf   : > { %v3112_v47 = vperm.slane %v1683_v49, %v2514_v25 }
 0x1d0   : > { %v3109_v30 = vpop.permute.xlu1 %1636 }
 0x1d1   : > { %3902 = vst [vmem:[#allocation10_spill] sm:$0xff] %v3112_v47  ;;  %v1715_v18 = vsel %vm155_vm0, %v1714_v20, %v3109_v30  ;;  %v1706_v14 = vrot.slane %v3112_v47, 4 }
 0x1d2   : > { %v1721_v39 = vperm.slane %v1715_v18, %v2481_v5  ;;  %v1208_v60 = vpop.permute.xlu2 %1207  ;;  %v1851_v33 = vpop.permute.xlu0 %1850 }
 0x1d3   : > { %v1232_v63 = vsel %vm155_vm0, %v1231_v41, %v1208_v60  ;;  %v1233_v29 = vrot.slane %v1208_v60, 4  ;;  %v1929_v49 = vsel %vm155_vm0, %v1928_v42, %v1851_v33  ;;  %v1930_v2 = vrot.slane %v1851_v33, 4 }
 0x1d4   : > { %v1740_v20 = vrot.slane %v1721_v39, 4  ;;  %v3132_v6 = vperm.slane %v1232_v63, %v2481_v5  ;;  %v3138_v46 = vperm.slane %v1929_v49, %v2481_v5  ;;  %v1707_v28 = vsel %vm155_vm0, 0.0, %v1706_v14 }
 0x1d5   : > { %v3135_v18 = vsel %vm155_vm0, %v1216_v40, %v1233_v29  ;;  %v1739_v61 = vsel %vm155_vm0, %v1738_v43, %v1721_v39  ;;  %v1255_v41 = vrot.slane %v3116_v57, 4  ;;  %v1952_v60 = vrot.slane %v3121_v53, 4  ;;  %1771 = vrot.lane.b32.xlu0 %v1707_v28, %s2395_s30 }
 0x1d6   : > { %v1741_v42 = vsel %vm155_vm0, %v1733_v23, %v1740_v20  ;;  %v3147_v33 = vperm.slane %v1739_v61, %v2514_v25  ;;  %v1931_v43 = vsel %vm155_vm0, %v2993_v9, %v1930_v2  ;;  %v3164_v61 = vperm.slane %v3014_v13, %v2481_v5 }
 0x1d7   : > { %v3152_v63 = vperm.slane %v1741_v42, %v2514_v25  ;;  %v1953_v14 = vsel %vm155_vm0, %v1952_v60, %v3138_v46  ;;  %v1256_v39 = vsel %vm155_vm0, %v1255_v41, %v3132_v6  ;;  %v1299_v9 = vrot.slane %v2990_v21, 4 }
 0x1d8   : > { %v3149_v40 = vpop.permute.xlu1 %1003  ;;  %v1762_v23 = vrot.slane %v3147_v33, 4  ;;  %v3171_v20 = vperm.slane %v1953_v14, %v2514_v25  ;;  %v3176_v2 = vperm.slane %v1256_v39, %v2514_v25  ;;  %v1684_v41 = vrot.slane %v3090_v17, 4 }
 0x1d9   : > { %v1037_v29 = vrot.slane %v3149_v40, 4  ;;  %1803 = vrot.lane.b32.xlu2 %v3152_v63, %s2392_s27  ;;  %v3186_v42 = vperm.slane %v1931_v43, %v2481_v5  ;;  %v1898_v39 = vrot.slane %v3037_v31, 4  ;;  %v1300_v21 = vsel %vm155_vm0, %v1299_v9, %v3031_v50 }
 0x1da   : > { %v3168_v49 = vpop.permute.xlu0 %1007  ;;  %3903 = vst [vmem:[#allocation11_spill] sm:$0xff] %v3171_v20  ;;  %v3173_v28 = vpop.permute.xlu2 %1001  ;;  %v1763_v60 = vsel %vm155_vm0, 0.0, %v1762_v23  ;;  %v1976_v14 = vrot.slane %v3171_v20, 4  ;;  %v1279_v47 = vrot.slane %v3176_v2, 4  ;;  %v3197_v23 = vperm.slane %v1094_v48, %v2481_v5 }
 0x1db   : > { %3904 = vst [vmem:[#allocation12_spill] sm:$0xff] %v3176_v2  ;;  %v3182_v13 = vsel %vm155_vm0, %v3018_v26, %v1037_v29  ;;  %1799 = vrot.lane.b32.xlu1 %v1763_v60, %s2395_s30  ;;  %v1081_v17 = vrot.slane %v3173_v28, 4  ;;  %v1964_v29 = vrot.slane %v3164_v61, 4  ;;  %v3202_v60 = vperm.slane %v3075_v0, %v2514_v25 }
 0x1dc   : > { %v1977_v43 = vsel %vm155_vm0, 0.0, %v1976_v14  ;;  %v1685_v50 = vsel %vm155_vm0, %v3063_v37, %v1684_v41  ;;  %v3208_v31 = vperm.slane %v1300_v21, %v2481_v5  ;;  %v1287_v14 = vrot.slane %v3016_v16, 4 }
 0x1dd   : > { %3905 = vst [vmem:[#allocation13_spill] sm:$0xff] %v3202_v60  ;;  %2013 = vrot.lane.b32.xlu0 %v1977_v43, %s2395_s30  ;;  %v3214_v48 = vsel %vm155_vm0, %v1964_v29, %v3186_v42  ;;  %v1280_v2 = vsel %vm155_vm0, 0.0, %v1279_v47  ;;  %v1899_v43 = vsel %vm155_vm0, %v3023_v52, %v1898_v39  ;;  %v1115_v37 = vrot.slane %v3197_v23, 4 }
 0x1de   : > { %v3228_v21 = vperm.slane %v1685_v50, %v2514_v25  ;;  %v1554_v20 = vrot.slane %v3202_v60, 4  ;;  %v1311_v52 = vrot.slane %v3208_v31, 4  ;;  %v1907_v50 = vperm.slane %v1899_v43, %v2514_v25 }
 0x1e0   : > { %v3210_v9 = vpop.permute.xlu1 %1009 }
 0x1e1   : > { %v1082_v0 = vsel %vm155_vm0, %v3210_v9, %v1081_v17  ;;  %1344 = vrot.lane.b32.xlu2 %v1280_v2, %s2395_s30  ;;  %v1954_v17 = vrot.slane %v3138_v46, 4  ;;  %v1310_v46 = vperm.slane %v3043_v58, %v2481_v5 }
 0x1e2   : > { %v3224_v41 = vperm.slane %v1082_v0, %v2481_v5  ;;  %v1210_v29 = vpop.permute.xlu0 %1209  ;;  %v1476_v0 = vrot.slane %v3099_v34, 4 }
 0x1e3   : > { %v1288_v47 = vsel %vm155_vm0, %v1287_v14, %v1210_v29  ;;  %v1289_v11 = vrot.slane %v1210_v29, 4  ;;  %1775 = vrot.lane.b32.xlu1 %v3228_v21, %s2392_s27  ;;  %v1555_v14 = vsel %vm155_vm0, 0.0, %v1554_v20  ;;  %v1955_v60 = vsel %vm155_vm0, %v3121_v53, %v1954_v17 }
 0x1e4   : > { %v3236_v39 = vsel %vm155_vm0, %v1115_v37, %v3224_v41  ;;  %v1294_v2 = vperm.slane %v1288_v47, %v2481_v5  ;;  %v3257_v34 = vsel %vm155_vm0, %v3056_v45, %v1476_v0  ;;  %v1254_v20 = vperm.slane %v3010_v4, %v2481_v5 }
 0x1e5   : > { %3906 = vst [vmem:[#allocation14_spill] sm:$0xff] %v3236_v39  ;;  %v1290_v37 = vsel %vm155_vm0, %v3016_v16, %v1289_v11  ;;  %1989 = vrot.lane.b32.xlu0 %v1907_v50, %s2392_s27  ;;  %v3266_v11 = vperm.slane %v3127_v24, %v2514_v25  ;;  %v1963_v45 = vperm.slane %v1955_v60, %v2514_v25  ;;  %v1532_v17 = vrot.slane %v3047_v12, 4 }
 0x1e6   : > { %v1312_v29 = vsel %vm155_vm0, %v1311_v52, %v1294_v2  ;;  %v1298_v16 = vperm.slane %v1290_v37, %v2481_v5  ;;  %v3275_v52 = vperm.slane %v2870_v27, %v2481_v5  ;;  %v1323_v4 = vrot.slane %v1310_v46, 4 }
 0x1e7   : > { %v3253_v47 = vperm.slane %v1312_v29, %v2514_v25  ;;  %3908 = vst [vmem:[#allocation16_spill] sm:$0xff] %v3266_v11  ;;  %v1242_v0 = vperm.slane %v3135_v18, %v2481_v5  ;;  %v1966_v24 = vrot.slane %v3186_v42, 4  ;;  %v1922_v60 = vrot.slane %v1907_v50, 4 }
 0x1e8   : > { %v3259_v58 = vpop.permute.xlu1 %999  ;;  %v1498_v12 = vrot.slane %v3266_v11, 4  ;;  %v1267_v37 = vrot.slane %v1254_v20, 4  ;;  %v3290_v39 = vsel %vm155_vm0, %v1323_v4, %v1298_v16  ;;  %v3294_v18 = vperm.slane %v2846_v10, %v2481_v5 }
 0x1e9   : > { %3907 = vst [vmem:[#allocation15_spill] sm:$0xff] %v3253_v47  ;;  %v1335_v43 = vrot.slane %v3253_v47, 4  ;;  %v1025_v53 = vrot.slane %v3259_v58, 4  ;;  %1591 = vrot.lane.b32.xlu2 %v1555_v14, %s2395_s30  ;;  %v3284_v14 = vsel %vm155_vm0, %v3027_v54, %v1532_v17  ;;  %v833_v42 = vrot.slane %v3275_v52, 4 }
 0x1ea   : > { %v3300_v54 = vperm.slane %v2912_v59, %v2481_v5  ;;  %v1046_v50 = vperm.slane %v3182_v13, %v2481_v5  ;;  %v1313_v10 = vrot.slane %v1294_v2, 4  ;;  %v1923_v4 = vsel %vm155_vm0, 0.0, %v1922_v60 }
 0x1eb   : > { %2017 = vrot.lane.b32.xlu1 %v1963_v45, %s2392_s27  ;;  %v1336_v29 = vsel %vm155_vm0, 0.0, %v1335_v43  ;;  %v1026_v27 = vsel %vm155_vm0, %v3168_v49, %v1025_v53  ;;  %v3305_v43 = vsel %vm155_vm0, %v1267_v37, %v1242_v0  ;;  %v3309_v53 = vsel %vm155_vm0, %v3164_v61, %v1966_v24 }
 0x1ec   : > { %v1034_v17 = vperm.slane %v1026_v27, %v2481_v5  ;;  %v1660_v59 = vrot.slane %v3070_v8, 4  ;;  %v1708_v13 = vrot.slane %v3228_v21, 4  ;;  %v1325_v11 = vrot.slane %v1298_v16, 4 }
 0x1ed   : > { %1372 = vrot.lane.b32.xlu0 %v1336_v29, %s2395_s30  ;;  %v1499_v29 = vsel %vm155_vm0, 0.0, %v1498_v12  ;;  %v1269_v37 = vrot.slane %v1242_v0, 4  ;;  %v1059_v47 = vrot.slane %v1046_v50, 4  ;;  %v834_v61 = vsel %vm155_vm0, %v833_v42, %v3300_v54 }
 0x1ee   : > { %v889_v2 = vrot.slane %v3294_v18, 4  ;;  %v3323_v24 = vperm.slane %v2909_v56, %v2481_v5  ;;  %v1061_v60 = vrot.slane %v1034_v17, 4  ;;  %v1314_v8 = vsel %vm155_vm0, %v3208_v31, %v1313_v10 }
 0x1ef   : > { %v3329_v21 = vperm.slane %v2998_v55, %v2481_v5  ;;  %v1661_v16 = vsel %vm155_vm0, %v2995_v38, %v1660_v59  ;;  %v1709_v0 = vsel %vm155_vm0, 0.0, %v1708_v13  ;;  %v3335_v12 = vsel %vm155_vm0, %v1059_v47, %v1034_v17 }
 0x1f0   : > { %v1117_v27 = vrot.slane %v3224_v41, 4  ;;  %v1764_v56 = vrot.slane %v3152_v63, 4  ;;  %v3341_v31 = vsel %vm155_vm0, %v1310_v46, %v1325_v11  ;;  %v3344_v55 = vperm.slane %v1314_v8, %v2514_v25 }
 0x1f1   : > { %1993 = vrot.lane.b32.xlu2 %v1923_v4, %s2394_s29  ;;  %v3347_v42 = vsel %vm155_vm0, %v1254_v20, %v1269_v37  ;;  %v3350_v38 = vperm.slane %v1661_v16, %v2481_v5  ;;  %v3353_v47 = vsel %vm155_vm0, %v1046_v50, %v1061_v60  ;;  %v1694_v41 = vrot.slane %v3329_v21, 4 }
 0x1f2   : > { %v1978_v63 = vrot.slane %v1963_v45, 4  ;;  %v890_v46 = vsel %vm155_vm0, %v889_v2, %v3323_v24  ;;  %v1035_v11 = vrot.slane %v3018_v26, 4  ;;  %v1257_v20 = vrot.slane %v3132_v6, 4 }
 0x1f3   : > { %1563 = vrot.lane.b32.xlu1 %v1499_v29, %s2395_s30  ;;  %v1765_v10 = vsel %vm155_vm0, 0.0, %v1764_v56  ;;  %v3365_v17 = vsel %vm155_vm0, %v3197_v23, %v1117_v27  ;;  %v1023_v45 = vrot.slane %v3168_v49, 4  ;;  %v1695_v4 = vsel %vm155_vm0, %v1694_v41, %v3350_v38 }
 0x1f4   : > { %v1036_v50 = vsel %vm155_vm0, %v1035_v11, %v3149_v40  ;;  %v1979_v26 = vsel %vm155_vm0, 0.0, %v1978_v63  ;;  %v1716_v6 = vrot.slane %v3109_v30, 4  ;;  %v1258_v23 = vsel %vm155_vm0, %v3116_v57, %v1257_v20 }
 0x1f5   : > { %1779 = vrot.lane.b32.xlu0 %v1709_v0, %s2394_s29  ;;  %v1024_v29 = vsel %vm155_vm0, %v1023_v45, %v3259_v58  ;;  %v3381_v59 = vperm.slane %v1036_v50, %v2481_v5  ;;  %v1701_v40 = vperm.slane %v1695_v4, %v2514_v25  ;;  %v1266_v30 = vperm.slane %v1258_v23, %v2514_v25 }
 0x1f6   : > { %v3385_v49 = vperm.slane %v1024_v29, %v2481_v5  ;;  %v1717_v58 = vsel %vm155_vm0, %v3000_v35, %v1716_v6  ;;  %v1485_v13 = vperm.slane %v3257_v34, %v2514_v25  ;;  %v3395_v57 = vperm.slane %v2986_v19, %v2481_v5 }
 0x1f7   : > { %v1047_v37 = vrot.slane %v3381_v59, 4  ;;  %v3400_v2 = vperm.slane %v1717_v58, %v2481_v5  ;;  %v1079_v34 = vrot.slane %v3210_v9, 4  ;;  %v1971_v19 = vperm.slane %v3214_v48, %v2514_v25 }
 0x1f8   : > { %v1750_v35 = vrot.slane %v3395_v57, 4  ;;  %v1541_v8 = vperm.slane %v3284_v14, %v2514_v25  ;;  %v3421_v9 = vperm.slane %v834_v61, %v2514_v25  ;;  %v3425_v48 = vperm.slane %v3083_v44, %v2481_v5 }
 0x1f9   : > { %1376 = vrot.lane.b32.xlu2 %v3344_v55, %s2392_s27  ;;  %v1048_v60 = vsel %vm155_vm0, %v1047_v37, %v3385_v49  ;;  %v1080_v27 = vsel %vm155_vm0, %v1079_v34, %v3173_v28  ;;  %v3437_v11 = vperm.slane %v890_v46, %v2514_v25  ;;  %v1915_v44 = vperm.slane %v3067_v3, %v2514_v25 }
 0x1fa   : > { %v3412_v16 = vperm.slane %v1048_v60, %v2514_v25  ;;  %v1751_v0 = vsel %vm155_vm0, %v1750_v35, %v3400_v2  ;;  %v3430_v41 = vperm.slane %v1080_v27, %v2481_v5  ;;  %v857_v28 = vrot.slane %v3421_v9, 4 }
 0x1fb   : > { %1807 = vrot.lane.b32.xlu1 %v1765_v10, %s2394_s29  ;;  %v1757_v14 = vperm.slane %v1751_v0, %v2514_v25  ;;  %v1103_v63 = vrot.slane %v3425_v48, 4  ;;  %v835_v50 = vrot.slane %v3300_v54, 4  ;;  %v1337_v45 = vrot.slane %v3344_v55, 4 }
 0x1fc   : > { %v1071_v56 = vrot.slane %v3412_v16, 4  ;;  %v858_v10 = vsel %vm155_vm0, 0.0, %v857_v28  ;;  %v913_v4 = vrot.slane %v3437_v11, 4  ;;  %v891_v55 = vrot.slane %v3323_v24, 4 }
 0x1fd   : > { %2021 = vrot.lane.b32.xlu0 %v1979_v26, %s2394_s29  ;;  %v1104_v20 = vsel %vm155_vm0, %v1103_v63, %v3430_v41  ;;  %v836_v26 = vsel %vm155_vm0, %v3275_v52, %v835_v50  ;;  %v1338_v3 = vsel %vm155_vm0, 0.0, %v1337_v45  ;;  %v1710_v23 = vrot.slane %v1701_v40, 4 }
 0x1fe   : > { %v1072_v61 = vsel %vm155_vm0, 0.0, %v1071_v56  ;;  %v3450_v46 = vperm.slane %v1104_v20, %v2514_v25  ;;  %v914_v6 = vsel %vm155_vm0, 0.0, %v913_v4  ;;  %v892_v29 = vsel %vm155_vm0, %v3294_v18, %v891_v55 }
 0x1ff   : > { %v1281_v58 = vrot.slane %v1266_v30, 4  ;;  %v1500_v37 = vrot.slane %v1485_v13, 4  ;;  %v1452_v60 = vrot.slane %v2903_v51, 4  ;;  %v1711_v35 = vsel %vm155_vm0, 0.0, %v1710_v23 }
 0x200   : > { %v1127_v54 = vrot.slane %v3450_v46, 4  ;;  %v1980_v18 = vrot.slane %v1971_v19, 4  ;;  %v1508_v51 = vrot.slane %v2924_v7, 4  ;;  %v1049_v56 = vrot.slane %v3385_v49, 4 }
 0x201   : > { %1783 = vrot.lane.b32.xlu2 %v1701_v40, %s2391_s26  ;;  %v1282_v24 = vsel %vm155_vm0, 0.0, %v1281_v58  ;;  %v1501_v34 = vsel %vm155_vm0, 0.0, %v1500_v37  ;;  %v1556_v40 = vrot.slane %v1541_v8, 4  ;;  %v1453_v0 = vsel %vm155_vm0, %v2854_v15, %v1452_v60 }
 0x202   : > { %v1128_v52 = vsel %vm155_vm0, 0.0, %v1127_v54  ;;  %v1509_v7 = vsel %vm155_vm0, %v2867_v22, %v1508_v51  ;;  %v3493_v28 = vperm.slane %v2828_v62, %v2481_v5  ;;  %v1050_v20 = vsel %vm155_vm0, %v3381_v59, %v1049_v56 }
 0x203   : > { %1348 = vrot.lane.b32.xlu1 %v1266_v30, %s2392_s27  ;;  %v3475_v30 = vperm.slane %v2811_v36, %v2481_v5  ;;  %v1766_v36 = vrot.slane %v1757_v14, 4  ;;  %v3496_v63 = vperm.slane %v1509_v7, %v2481_v5  ;;  %v1924_v62 = vrot.slane %v1915_v44, 4 }
 0x204   : > { %v844_v45 = vperm.slane %v836_v26, %v2514_v25  ;;  %v1105_v59 = vrot.slane %v3430_v41, 4 }
 0x205   : > { %1567 = vrot.lane.b32.xlu0 %v1485_v13, %s2392_s27  ;;  %v3479_v13 = vperm.slane %v1453_v0, %v2481_v5  ;;  %v1486_v27 = vrot.slane %v3475_v30, 4  ;;  %v1925_v50 = vsel %vm155_vm0, 0.0, %v1924_v62  ;;  %v3576_v0 = vperm.slane %v2873_v32, %v2481_v5  ;;  %v3911_v32 = vld [vmem:[#allocation8_spill] sm:$0xff] }
 0x206   : > { %v1106_v54 = vsel %vm155_vm0, %v3425_v48, %v1105_v59 }
 0x207   : > { %v1487_v15 = vsel %vm155_vm0, %v1486_v27, %v3479_v13  ;;  %v1114_v41 = vperm.slane %v1106_v54, %v2514_v25 }
 0x208   : > { %v3536_v48 = vperm.slane %v1487_v15, %v2514_v25  ;;  %v3910_v15 = vld [vmem:[#allocation10_spill] sm:$0xff] }
 0x209   : > { %2025 = vrot.lane.b32.xlu2 %v1971_v19, %s2391_s26  ;;  %v1981_v19 = vsel %vm155_vm0, 0.0, %v1980_v18  ;;  %v1129_v59 = vrot.slane %v1114_v41, 4 }
 0x20b   : > { %1595 = vrot.lane.b32.xlu1 %v1541_v8, %s2392_s27  ;;  %v1557_v8 = vsel %vm155_vm0, 0.0, %v1556_v40  ;;  %v3572_v40 = vperm.slane %v3078_v1, %v2514_v25 }
 0x20d   : > { %1811 = vrot.lane.b32.xlu0 %v1757_v14, %s2391_s26  ;;  %v1767_v14 = vsel %vm155_vm0, 0.0, %v1766_v36 }
 0x211   : > { %1136 = vrot.lane.b32.xlu2 %v1072_v61, %s2395_s30  ;;  %v1542_v61 = vrot.slane %v3493_v28, 4 }
 0x213   : > { %1997 = vrot.lane.b32.xlu1 %v1915_v44, %s2391_s26  ;;  %v1543_v22 = vsel %vm155_vm0, %v1542_v61, %v3496_v63  ;;  %v900_v44 = vperm.slane %v892_v29, %v2514_v25  ;;  %v3591_v61 = vperm.slane %v3911_v32, %v2481_v5 }
 0x215   : > { %922 = vrot.lane.b32.xlu0 %v858_v10, %s2395_s30  ;;  %v1058_v10 = vperm.slane %v1050_v20, %v2514_v25  ;;  %v915_v56 = vrot.slane %v900_v44, 4  ;;  %v845_v20 = vrot.slane %v3576_v0, 4 }
 0x217   : > { %v1073_v60 = vrot.slane %v1058_v10, 4 }
 0x219   : > { %1380 = vrot.lane.b32.xlu2 %v1338_v3, %s2394_s29  ;;  %v1330_v3 = vperm.slane %v3290_v39, %v2514_v25  ;;  %v1074_v18 = vsel %vm155_vm0, 0.0, %v1073_v60  ;;  %v1130_v60 = vsel %vm155_vm0, 0.0, %v1129_v59 }
 0x21b   : > { %950 = vrot.lane.b32.xlu1 %v914_v6, %s2395_s30  ;;  %v1696_v6 = vrot.slane %v3350_v38, 4  ;;  %v3533_v38 = vperm.slane %v3305_v43, %v2514_v25  ;;  %v3550_v43 = vperm.slane %v1543_v22, %v2514_v25  ;;  %v1339_v27 = vrot.slane %v1330_v3, 4 }
 0x21d   : > { %1164 = vrot.lane.b32.xlu0 %v1128_v52, %s2395_s30  ;;  %v1697_v55 = vsel %vm155_vm0, %v3329_v21, %v1696_v6  ;;  %v1752_v21 = vrot.slane %v3400_v2, 4  ;;  %v3547_v52 = vperm.slane %v3309_v53, %v2514_v25 }
 0x21e   : > { %v1705_v39 = vperm.slane %v1697_v55, %v2514_v25 }
 0x21f   : > { %v1753_v58 = vsel %vm155_vm0, %v3395_v57, %v1752_v21  ;;  %v3914_v21 = vld [vmem:[#allocation11_spill] sm:$0xff] }
 0x220   : > { %v3559_v37 = vperm.slane %v1753_v58, %v2514_v25  ;;  %v1712_v55 = vrot.slane %v1705_v39, 4 }
 0x221   : > { %1787 = vrot.lane.b32.xlu2 %v1711_v35, %s2397_s4 }
 0x223   : > { %1352 = vrot.lane.b32.xlu1 %v1282_v24, %s2394_s29  ;;  %v859_v24 = vrot.slane %v844_v45, 4 }
 0x225   : > { %1571 = vrot.lane.b32.xlu0 %v1501_v34, %s2394_s29  ;;  %v860_v51 = vsel %vm155_vm0, 0.0, %v859_v24  ;;  %v1713_v24 = vsel %vm155_vm0, 0.0, %v1712_v55 }
 0x226   : > { %v3498_v49 = vpop.permute.xlu2 %1985 }
 0x229   : > { %2029 = vrot.lane.b32.xlu2 %v1981_v19, %s2397_s4  ;;  %v3909_v19 = vld [vmem:[#allocation6_spill] sm:$0xff] }
 0x22b   : > { %1599 = vrot.lane.b32.xlu1 %v1557_v8, %s2394_s29  ;;  %v3583_v8 = vperm.slane %v3909_v19, %v2481_v5  ;;  %v1982_v19 = vrot.slane %v3547_v52, 4 }
 0x22d   : > { %1815 = vrot.lane.b32.xlu0 %v1767_v14, %s2397_s4  ;;  %v3912_v14 = vld [vmem:[#allocation9_spill] sm:$0xff]  ;;  %v901_v6 = vrot.slane %v3583_v8, 4 }
 0x22e   : > { %v2040_v22 = vsel %vm323_vm1, %v3912_v14, %v3498_v49 }
 0x231   : > { %1140 = vrot.lane.b32.xlu2 %v1058_v10, %s2392_s27  ;;  %v1340_v10 = vsel %vm155_vm0, 0.0, %v1339_v27 }
 0x233   : > { %2001 = vrot.lane.b32.xlu1 %v1925_v50, %s2397_s4  ;;  %v1804_v4 = vpop.permute.xlu2 %1803  ;;  %v916_v50 = vsel %vm155_vm0, 0.0, %v915_v56 }
 0x235   : > { %926 = vrot.lane.b32.xlu0 %v844_v45, %s2392_s27  ;;  %v846_v45 = vsel %vm155_vm0, %v845_v20, %v3591_v61 }
 0x239   : > { %1384 = vrot.lane.b32.xlu2 %v1330_v3, %s2391_s26  ;;  %v3913_v3 = vld [vmem:[#allocation7_spill] sm:$0xff] }
 0x23b   : > { %954 = vrot.lane.b32.xlu1 %v900_v44, %s2392_s27  ;;  %v3523_v26 = vpop.permute.xlu2 %1344  ;;  %v3605_v44 = vperm.slane %v3913_v3, %v2481_v5  ;;  %v1283_v5 = vrot.slane %v3533_v38, 4 }
 0x23d   : > { %1168 = vrot.lane.b32.xlu0 %v1114_v41, %s2392_s27  ;;  %v902_v54 = vsel %vm155_vm0, %v901_v6, %v3605_v44  ;;  %v1284_v27 = vsel %vm155_vm0, 0.0, %v1283_v5 }
 0x23e   : > { %v908_v55 = vperm.slane %v902_v54, %v2514_v25  ;;  %v3918_v54 = vld [vmem:[#allocation14_spill] sm:$0xff] }
 0x241   : > { %1791 = vrot.lane.b32.xlu2 %v1705_v39, %s2393_s28  ;;  %v3915_v39 = vld [vmem:[#allocation15_spill] sm:$0xff] }
 0x243   : > { %1356 = vrot.lane.b32.xlu1 %v3533_v38, %s2391_s26  ;;  %v3540_v29 = vpop.permute.xlu2 %1591 }
 0x245   : > { %1575 = vrot.lane.b32.xlu0 %v3536_v48, %s2391_s26 }
 0x247   : > { %v1772_v23 = vpop.permute.xlu0 %1771 }
 0x248   : > { %v1826_v1 = vsel %vm323_vm1, %v3910_v15, %v1772_v23  ;;  %v1544_v15 = vrot.slane %v3496_v63, 4 }
 0x249   : > { %2033 = vrot.lane.b32.xlu2 %v3547_v52, %s2393_s28  ;;  %v1768_v52 = vrot.slane %v3559_v37, 4 }
 0x24a   : > { %v1545_v63 = vsel %vm155_vm0, %v3493_v28, %v1544_v15 }
 0x24b   : > { %1603 = vrot.lane.b32.xlu1 %v3550_v43, %s2391_s26  ;;  %v1994_v2 = vpop.permute.xlu2 %1993 }
 0x24d   : > { %v1800_v35 = vpop.permute.xlu1 %1799  ;;  %1819 = vrot.lane.b32.xlu0 %v3559_v37, %s2393_s28  ;;  %v3654_v37 = vperm.slane %v3335_v12, %v2514_v25  ;;  %v3916_v12 = vld [vmem:[#allocation12_spill] sm:$0xff] }
 0x24e   : > { %v1833_v53 = vsel %vm323_vm1, %v3147_v33, %v1800_v35  ;;  %v1502_v35 = vrot.slane %v3536_v48, 4  ;;  %v1399_v3 = vsel %vm323_vm1, %v3916_v12, %v3523_v26  ;;  %v903_v26 = vrot.slane %v3605_v44, 4 }
 0x24f   : > { %v3566_v34 = vsel %vm325_vm2, %v1833_v53, %v1804_v4  ;;  %v2014_v57 = vpop.permute.xlu0 %2013 }
 0x250   : > { %v2047_v23 = vsel %vm323_vm1, %v3914_v21, %v2014_v57  ;;  %v1503_v48 = vsel %vm155_vm0, 0.0, %v1502_v35  ;;  %v3917_v21 = vld [vmem:[#allocation16_spill] sm:$0xff]  ;;  %v1122_v35 = vperm.slane %v3918_v54, %v2514_v25 }
 0x251   : > { %1144 = vrot.lane.b32.xlu2 %v1074_v18, %s2394_s29 }
 0x253   : > { %2005 = vrot.lane.b32.xlu1 %v3572_v40, %s2393_s28  ;;  %v1377_v33 = vpop.permute.xlu2 %1376 }
 0x255   : > { %v1776_v36 = vpop.permute.xlu1 %1775  ;;  %930 = vrot.lane.b32.xlu0 %v860_v51, %s2394_s29  ;;  %v1488_v51 = vrot.slane %v3479_v13, 4 }
 0x256   : > { %v1827_v7 = vsel %vm325_vm2, %v1826_v1, %v1776_v36 }
 0x257   : > { %v1990_v62 = vpop.permute.xlu0 %1989  ;;  %v1489_v13 = vsel %vm155_vm0, %v3475_v30, %v1488_v51 }
 0x258   : > { %v2041_v4 = vsel %vm325_vm2, %v2040_v22, %v1990_v62  ;;  %v1769_v22 = vsel %vm155_vm0, 0.0, %v1768_v52 }
 0x259   : > { %1388 = vrot.lane.b32.xlu2 %v1340_v10, %s2397_s4  ;;  %v3620_v18 = vsel %vm327_vm3, %v2041_v4, %v1994_v2  ;;  %v1558_v2 = vrot.slane %v3550_v43, 4  ;;  %v852_v4 = vperm.slane %v846_v45, %v2514_v25  ;;  %v3673_v45 = vperm.slane %v3341_v31, %v2514_v25 }
 0x25a   : > { %v904_v31 = vsel %vm155_vm0, %v3583_v8, %v903_v26  ;;  %v1278_v8 = vperm.slane %v3347_v42, %v2514_v25  ;;  %v1553_v42 = vperm.slane %v1545_v63, %v2514_v25  ;;  %v1075_v63 = vrot.slane %v3654_v37, 4 }
 0x25b   : > { %958 = vrot.lane.b32.xlu1 %v916_v50, %s2394_s29  ;;  %v1784_v49 = vpop.permute.xlu2 %1783  ;;  %v1559_v32 = vsel %vm155_vm0, 0.0, %v1558_v2 }
 0x25d   : > { %v2018_v58 = vpop.permute.xlu1 %2017  ;;  %1172 = vrot.lane.b32.xlu0 %v1130_v60, %s2394_s29 }
 0x25e   : > { %v2048_v41 = vsel %vm325_vm2, %v2047_v23, %v2018_v58 }
 0x25f   : > { %v1373_v53 = vpop.permute.xlu0 %1372 }
 0x260   : > { %v1406_v57 = vsel %vm323_vm1, %v3915_v39, %v1373_v53  ;;  %v3919_v53 = vld [vmem:[#allocation13_spill] sm:$0xff] }
 0x261   : > { %1795 = vrot.lane.b32.xlu2 %v1713_v24, %s2396_s3  ;;  %v1407_v56 = vsel %vm325_vm2, %v1406_v57, %v1377_v33  ;;  %v1983_v33 = vsel %vm155_vm0, 0.0, %v1982_v19  ;;  %v1625_v24 = vsel %vm323_vm1, %v3919_v53, %v3540_v29  ;;  %v1497_v29 = vperm.slane %v1489_v13, %v2514_v25 }
 0x262   : > { %v1131_v19 = vrot.slane %v1122_v35, 4 }
 0x263   : > { %1360 = vrot.lane.b32.xlu1 %v1284_v27, %s2397_s4  ;;  %v2026_v38 = vpop.permute.xlu2 %2025 }
 0x264   : > { %v1132_v13 = vsel %vm155_vm0, 0.0, %v1131_v19 }
 0x265   : > { %v1564_v1 = vpop.permute.xlu1 %1563  ;;  %1579 = vrot.lane.b32.xlu0 %v1503_v48, %s2397_s4 }
 0x266   : > { %v1618_v23 = vsel %vm323_vm1, %v3917_v21, %v1564_v1 }
 0x267   : > { %v1780_v36 = vpop.permute.xlu0 %1779 }
 0x268   : > { %v1828_v20 = vsel %vm327_vm3, %v1827_v7, %v1780_v36  ;;  %v1926_v7 = vrot.slane %v3572_v40, 4  ;;  %v1504_v36 = vrot.slane %v1497_v29, 4 }
 0x269   : > { %2037 = vrot.lane.b32.xlu2 %v1983_v33, %s2396_s3  ;;  %v3644_v43 = vsel %vm329_vm4, %v1828_v20, %v1784_v49 }
 0x26a   : > { %v1927_v50 = vsel %vm155_vm0, 0.0, %v1926_v7  ;;  %v1505_v52 = vsel %vm155_vm0, 0.0, %v1504_v36 }
 0x26b   : > { %1607 = vrot.lane.b32.xlu1 %v1559_v32, %s2397_s4  ;;  %v1137_v30 = vpop.permute.xlu2 %1136 }
 0x26d   : > { %v1808_v14 = vpop.permute.xlu1 %1807  ;;  %1823 = vrot.lane.b32.xlu0 %v1769_v22, %s2396_s3  ;;  %v1285_v22 = vrot.slane %v1278_v8, 4 }
 0x26e   : > { %v1835_v62 = vsel %vm327_vm3, %v3566_v34, %v1808_v14 }
 0x26f   : > { %v2022_v28 = vpop.permute.xlu0 %2021 }
 0x270   : > { %v2049_v10 = vsel %vm327_vm3, %v2048_v41, %v2022_v28  ;;  %v861_v41 = vrot.slane %v852_v4, 4  ;;  %v1286_v28 = vsel %vm155_vm0, 0.0, %v1285_v22 }
 0x271   : > { %1148 = vrot.lane.b32.xlu2 %v3654_v37, %s2391_s26  ;;  %v3662_v34 = vsel %vm329_vm4, %v2049_v10, %v2026_v38  ;;  %v912_v10 = vperm.slane %v904_v31, %v2514_v25  ;;  %v1341_v37 = vrot.slane %v3673_v45, 4 }
 0x272   : > { %v862_v44 = vsel %vm155_vm0, 0.0, %v861_v41  ;;  %v1070_v41 = vperm.slane %v3353_v47, %v2514_v25 }
 0x273   : > { %2009 = vrot.lane.b32.xlu1 %v1927_v50, %s2396_s3  ;;  %v1381_v40 = vpop.permute.xlu2 %1380 }
 0x274   : > { %v1408_v59 = vsel %vm327_vm3, %v1407_v56, %v1381_v40  ;;  %v847_v56 = vrot.slane %v3591_v61, 4  ;;  %v917_v61 = vrot.slane %v908_v55, 4  ;;  %v1560_v40 = vrot.slane %v1553_v42, 4 }
 0x275   : > { %v1349_v6 = vpop.permute.xlu1 %1348  ;;  %934 = vrot.lane.b32.xlu0 %v852_v4, %s2391_s26 }
 0x276   : > { %v1400_v49 = vsel %vm325_vm2, %v1399_v3, %v1349_v6  ;;  %v848_v48 = vsel %vm155_vm0, %v3576_v0, %v847_v56  ;;  %v1191_v0 = vsel %vm323_vm1, %v3412_v16, %v1137_v30  ;;  %v1076_v16 = vsel %vm155_vm0, 0.0, %v1075_v63 }
 0x277   : > { %v1568_v58 = vpop.permute.xlu0 %1567  ;;  %v856_v4 = vperm.slane %v848_v48, %v2514_v25  ;;  %v2056_v56 = vlaneseq }
 0x278   : > { %v1619_v60 = vsel %vm325_vm2, %v1618_v23, %v1568_v58 }
 0x279   : > { %1392 = vrot.lane.b32.xlu2 %v3673_v45, %s2393_s28  ;;  %v863_v6 = vrot.slane %v856_v4, 4  ;;  %vm2058_vm10 = vcmp.lt.s32.totalorder %v2056_v56, 256 }
 0x27b   : > { %962 = vrot.lane.b32.xlu1 %v908_v55, %s2391_s26  ;;  %v3683_v5 = vpop.permute.xlu2 %1787  ;;  %v864_v23 = vsel %vm155_vm0, 0.0, %v863_v6 }
 0x27d   : > { %v1596_v39 = vpop.permute.xlu1 %1595  ;;  %1176 = vrot.lane.b32.xlu0 %v1122_v35, %s2391_s26  ;;  %v919_v35 = vrot.slane %v912_v10, 4  ;;  %s2192_s26 = sshll.u32 %s2188_s23, 4  ;;  %s2193_s26 = int_to_ptr.hbm [resolvable:$true] %s2192_s26 }
 0x27e   : > { %v1626_v57 = vsel %vm325_vm2, %v1625_v24, %v1596_v39  ;;  %s2339_s27 = sshra.s32 %s2193_s26, 4  ;;  %s2340_s27 = int_to_ptr.hbm [resolvable:$true] %s2339_s27 }
 0x27f   : > { %v1812_v51 = vpop.permute.xlu0 %1811  ;;  %p2346_p0 = scmp.lt.s32.totalorder %s2340_s27, %s3888_s2 }
 0x280   : > { %v3696_v27 = vsel %vm329_vm4, %v1835_v62, %v1812_v51 }
 0x281   : > { %938 = vrot.lane.b32.xlu2 %v862_v44, %s2397_s4 }
 0x283   : > { %1364 = vrot.lane.b32.xlu1 %v1278_v8, %s2393_s28  ;;  %v3704_v38 = vpop.permute.xlu2 %2029  ;;  %v1077_v8 = vrot.slane %v1070_v41, 4 }
 0x285   : > { %v1998_v2 = vpop.permute.xlu1 %1997  ;;  %1583 = vrot.lane.b32.xlu0 %v1497_v29, %s2393_s28 }
 0x286   : > { %v3710_v15 = vsel %vm329_vm4, %v3620_v18, %v1998_v2  ;;  %v918_v18 = vsel %vm155_vm0, 0.0, %v917_v61  ;;  %v2400_v2 = vmov 1.0  }
 0x287   : > { %v923_v1 = vpop.permute.xlu0 %922  ;;  %2061 = vst.msk [vmem:[#allocation2 + $0x44] ss:$8 sm:$0x3] %vm2058_vm10, %v2400_v2 }
 0x288   : > { %v977_v53 = vsel %vm323_vm1, %v3421_v9, %v923_v1 }
 0x289   : > { %1180 = vrot.lane.b32.xlu2 %v1132_v13, %s2397_s4 }
 0x28b   : > { %1611 = vrot.lane.b32.xlu1 %v1553_v42, %s2393_s28  ;;  %v1141_v33 = vpop.permute.xlu2 %1140  ;;  %v1078_v42 = vsel %vm155_vm0, 0.0, %v1077_v8 }
 0x28c   : > { %v1192_v32 = vsel %vm325_vm2, %v1191_v0, %v1141_v33 }
 0x28d   : > { %v951_v20 = vpop.permute.xlu1 %950  ;;  %966 = vrot.lane.b32.xlu0 %v918_v18, %s2397_s4 }
 0x28e   : > { %v984_v44 = vsel %vm323_vm1, %v3437_v11, %v951_v20 }
 0x28f   : > { %v1165_v14 = vpop.permute.xlu0 %1164 }
 0x290   : > { %v1198_v29 = vsel %vm323_vm1, %v3450_v46, %v1165_v14  ;;  %v1830_v46 = vsel %vm331_vm5, %v3644_v43, %v3683_v5  ;;  %v2051_v14 = vsel %vm331_vm5, %v3662_v34, %v3704_v38  ;;  %vm2172_vm1 = vcmask 1043456  }
 0x291   : > { %1587 = vrot.lane.b32.xlu2 %v1505_v52, %s2396_s3 }
 0x293   : > { %1152 = vrot.lane.b32.xlu1 %v1076_v16, %s2397_s4  ;;  %v1385_v30 = vpop.permute.xlu2 %1384 }
 0x294   : > { %v1409_v62 = vsel %vm329_vm4, %v1408_v59, %v1385_v30  ;;  %v1342_v59 = vsel %vm155_vm0, 0.0, %v1341_v37 }
 0x295   : > { %v1353_v7 = vpop.permute.xlu1 %1352  ;;  %1368 = vrot.lane.b32.xlu0 %v1286_v28, %s2396_s3 }
 0x296   : > { %v1401_v50 = vsel %vm327_vm3, %v1400_v49, %v1353_v7  ;;  %v1561_v49 = vsel %vm155_vm0, 0.0, %v1560_v40 }
 0x297   : > { %v1572_v12 = vpop.permute.xlu0 %1571 }
 0x298   : > { %v3735_v3 = vsel %vm327_vm3, %v1619_v60, %v1572_v12  ;;  %v1126_v60 = vperm.slane %v3365_v17, %v2514_v25  ;;  %v920_v25 = vsel %vm155_vm0, 0.0, %v919_v35 }
 0x299   : > { %970 = vrot.lane.b32.xlu2 %v912_v10, %s2393_s28 }
 0x29a   : > { %v1133_v31 = vrot.slane %v1126_v60, 4 }
 0x29b   : > { %1396 = vrot.lane.b32.xlu1 %v1342_v59, %s2396_s3  ;;  %v1792_v55 = vpop.permute.xlu2 %1791 }
 0x29c   : > { %v1134_v17 = vsel %vm155_vm0, 0.0, %v1133_v31  ;;  %v1831_v0 = vsel %vm333_vm6, %v1830_v46, %v1792_v55 }
 0x29d   : > { %v1600_v21 = vpop.permute.xlu1 %1599  ;;  %1615 = vrot.lane.b32.xlu0 %v1561_v49, %s2396_s3 }
 0x29e   : > { %v1627_v45 = vsel %vm327_vm3, %v1626_v57, %v1600_v21 }
 0x29f   : > { %v3744_v58 = vpop.permute.xlu0 %1815 }
 0x2a0   : > { %v1837_v6 = vsel %vm331_vm5, %v3696_v27, %v3744_v58 }
 0x2a1   : > { %946 = vrot.lane.b32.xlu2 %v864_v23, %s2396_s3 }
 0x2a3   : > { %942 = vrot.lane.b32.xlu1 %v856_v4, %s2393_s28  ;;  %v2034_v26 = vpop.permute.xlu2 %2033 }
 0x2a4   : > { %v2052_v22 = vsel %vm333_vm6, %v2051_v14, %v2034_v26 }
 0x2a5   : > { %v3752_v54 = vpop.permute.xlu1 %2001  ;;  %1156 = vrot.lane.b32.xlu0 %v1070_v41, %s2393_s28 }
 0x2a6   : > { %v2044_v23 = vsel %vm331_vm5, %v3710_v15, %v3752_v54 }
 0x2a7   : > { %v927_v24 = vpop.permute.xlu0 %926 }
 0x2a8   : > { %v978_v39 = vsel %vm325_vm2, %v977_v53, %v927_v24 }
 0x2a9   : > { %1188 = vrot.lane.b32.xlu2 %v1134_v17, %s2396_s3 }
 0x2ab   : > { %1184 = vrot.lane.b32.xlu1 %v1126_v60, %s2393_s28  ;;  %v1145_v57 = vpop.permute.xlu2 %1144  ;;  %s2341_s28 = scalar_lea.hbm %s2340_s27, 8 }
 0x2ac   : > { %v1193_v47 = vsel %vm327_vm3, %v1192_v32, %v1145_v57  ;;  %p2342_p11 = scmp.ne.s32.totalorder %s2340_s27, %s2341_s28 }
 0x2ad   : > { %v955_v51 = vpop.permute.xlu1 %954  ;;  %974 = vrot.lane.b32.xlu0 %v920_v25, %s2396_s3 }
 0x2ae   : > { %v985_v9 = vsel %vm325_vm2, %v984_v44, %v955_v51  ;;  %p2343_p12 = pnand %p2342_p11, %p2455_p5 }
 0x2af   : > { %v1169_v48 = vpop.permute.xlu0 %1168 }
 0x2b0   : > { %v1199_v19 = vsel %vm325_vm2, %v1198_v29, %v1169_v48  ;;  %p2344_p13 = pneg %p2343_p12 }
 0x2b3   : > { %1160 = vrot.lane.b32.xlu1 %v1078_v42, %s2396_s3  ;;  %v1389_v11 = vpop.permute.xlu2 %1388  ;;  %s2345_s3 = scalar_lea.hbm %s3888_s2, 16 }
 0x2b4   : > { %v3773_v61 = vsel %vm331_vm5, %v1409_v62, %v1389_v11  ;;  %p2347_p1 = scmp.lt.s32.totalorder %s2345_s3, %s2341_s28 }
 0x2b5   : > { %v1357_v1 = vpop.permute.xlu1 %1356 }
 0x2b6   : > { %v3776_v13 = vsel %vm329_vm4, %v1401_v50, %v1357_v1  ;;  %p2348_p2 = por %p2347_p1, %p2346_p0 }
 0x2b7   : > { %v1576_v36 = vpop.permute.xlu0 %1575 }
 0x2b8   : > { %p2349_p3 = pnand %p2348_p2, %p2344_p13 }
 0x2bb   : > { %v1796_v33 = vpop.permute.xlu2 %1795 }
 0x2bc   : > { %v1832_v18 = vsel %vm335_vm7, %v1831_v0, %v1796_v33 }
 0x2bd   : > { %v1842_v32 = vrot.slane %v1832_v18, 4  ;;  %v1604_v20 = vpop.permute.xlu1 %1603 }
 0x2be   : > { %v3784_v52 = vsel %vm329_vm4, %v1627_v45, %v1604_v20 }
 0x2bf   : > { %1846 = vst [vmem:[#allocation2 + $0x30] sm:$0xf0] %v1842_v32  ;;  %v1820_v63 = vpop.permute.xlu0 %1819 }
 0x2c0   : > { %v1838_v55 = vsel %vm333_vm6, %v1837_v6, %v1820_v63 }
 0x2c3   : > { %v2038_v16 = vpop.permute.xlu2 %2037 }
 0x2c4   : > { %v2053_v43 = vsel %vm335_vm7, %v2052_v22, %v2038_v16 }
 0x2c5   : > { %2055 = vst [vmem:[#allocation2 + $0x48] sm:$0xf] %v2053_v43  ;;  %v2006_v5 = vpop.permute.xlu1 %2005 }
 0x2c6   : > { %v2045_v60 = vsel %vm333_vm6, %v2044_v23, %v2006_v5  ;;  %v2065_v23 = vld [vmem:[#allocation2 + $0x8] sm:$0xff] }
 0x2c7   : > { %v931_v30 = vpop.permute.xlu0 %930 }
 0x2c8   : > { %v979_v62 = vsel %vm327_vm3, %v978_v39, %v931_v30  ;;  %v1621_v39 = vsel %vm329_vm4, %v3735_v3, %v1576_v36 }
 0x2cb   : > { %v1149_v7 = vpop.permute.xlu2 %1148 }
 0x2cc   : > { %v3793_v28 = vsel %vm329_vm4, %v1193_v47, %v1149_v7  ;;  %v2073_v10 = vld [vmem:[#allocation2 + $0x48] sm:$0x1f] }
 0x2cd   : > { %v959_v50 = vpop.permute.xlu1 %958  ;;  %2260 = vmatpush.msk.msra.mxu1 %vm2078_vm11, %v2073_v10 }
 0x2ce   : > { %v3797_v34 = vsel %vm327_vm3, %v985_v9, %v959_v50 }
 0x2cf   : > { %v1173_v38 = vpop.permute.xlu0 %1172 }
 0x2d0   : > { %v3800_v37 = vsel %vm327_vm3, %v1199_v19, %v1173_v38 }
 0x2d3   : > { %v1393_v12 = vpop.permute.xlu2 %1392 }
 0x2d4   : > { %v1411_v42 = vsel %vm333_vm6, %v3773_v61, %v1393_v12 }
 0x2d5   : > { %v1361_v4 = vpop.permute.xlu1 %1360 }
 0x2d6   : > { %v1403_v56 = vsel %vm331_vm5, %v3776_v13, %v1361_v4 }
 0x2d7   : > { %v1580_v40 = vpop.permute.xlu0 %1579 }
 0x2d8   : > { %v1622_v15 = vsel %vm331_vm5, %v1621_v39, %v1580_v40 }
 0x2db   : > { %v939_v26 = vpop.permute.xlu2 %938 }
 0x2dd   : > { %v1608_v59 = vpop.permute.xlu1 %1607 }
 0x2de   : > { %v1629_v36 = vsel %vm331_vm5, %v3784_v52, %v1608_v59 }
 0x2df   : > { %v1824_v49 = vpop.permute.xlu0 %1823 }
 0x2e0   : > { %v1839_v21 = vsel %vm335_vm7, %v1838_v55, %v1824_v49 }
 0x2e1   : > { %v1843_v45 = vrot.slane %v1839_v21, 4 }
 0x2e3   : > { %1847 = vst [vmem:[#allocation2 + $0x38] sm:$0xf0] %v1843_v45  ;;  %v1181_v53 = vpop.permute.xlu2 %1180  ;;  %v2063_v45 = vld [vmem:[%s3887_s1] sm:$0x1f] }
 0x2e5   : > { %v2010_v41 = vpop.permute.xlu1 %2009 }
 0x2e6   : > { %v2046_v31 = vsel %vm335_vm7, %v2045_v60, %v2010_v41 }
 0x2e7   : > { %2054 = vst [vmem:[#allocation2 + $0x40] sm:$0xf] %v2046_v31  ;;  %v935_v35 = vpop.permute.xlu0 %934 }
 0x2e8   : > { %v980_v18 = vsel %vm329_vm4, %v979_v62, %v935_v35 }
 0x2e9   : > { %v981_v61 = vsel %vm331_vm5, %v980_v18, %v939_v26  ;;  %v2064_v26 = vld [vmem:[#allocation2] sm:$0xff] }
 0x2eb   : > { %v1588_v57 = vpop.permute.xlu2 %1587 }
 0x2ed   : > { %v963_v27 = vpop.permute.xlu1 %962 }
 0x2ee   : > { %v2072_v58 = vld [vmem:[#allocation2 + $0x40] sm:$0x1f]  ;;  %v987_v5 = vsel %vm329_vm4, %v3797_v34, %v963_v27 }
 0x2ef   : > { %2258 = vmatpush.msk.msra.mxu0 %vm2078_vm11, %v2072_v58  ;;  %v1177_v24 = vpop.permute.xlu0 %1176 }
 0x2f0   : > { %v1201_v43 = vsel %vm329_vm4, %v3800_v37, %v1177_v24 }
 0x2f1   : > { %v1202_v7 = vsel %vm331_vm5, %v1201_v43, %v1181_v53 }
 0x2f3   : > { %v971_v19 = vpop.permute.xlu2 %970 }
 0x2f5   : > { %v1365_v17 = vpop.permute.xlu1 %1364 }
 0x2f6   : > { %v1404_v29 = vsel %vm333_vm6, %v1403_v56, %v1365_v17  ;;  %v2401_v17 = vmov 256.0  }
 0x2f7   : > { %v1584_v54 = vpop.permute.xlu0 %1583  ;;  %2321 = vrcp.f32 %v2401_v17 }
 0x2f8   : > { %v1623_v25 = vsel %vm333_vm6, %v1622_v15, %v1584_v54 }
 0x2f9   : > { %v1624_v47 = vsel %vm335_vm7, %v1623_v25, %v1588_v57 }
 0x2fa   : > { %1632 = vst [vmem:[#allocation2 + $0x30] sm:$0xf] %v1624_v47 }
 0x2fb   : > { %v947_v32 = vpop.permute.xlu2 %946 }
 0x2fd   : > { %v1612_v44 = vpop.permute.xlu1 %1611  ;;  %v2322_v39 = vpop.eup %2321 }
 0x2fe   : > { %v1630_v13 = vsel %vm333_vm6, %v1629_v36, %v1612_v44  ;;  %v2133_v15 = vmul.f32 256.0, %v2322_v39  ;;  %vm2137_vm13 = vweird.f32 %v2322_v39 }
 0x2ff   : > { %v967_v51 = vpop.permute.xlu0 %966 }
 0x300   : > { %v988_v30 = vsel %vm331_vm5, %v987_v5, %v967_v51  ;;  %v2134_v54 = vsub.f32 1.0, %v2133_v15 }
 0x301   : > { %v2070_v9 = vld [vmem:[#allocation2 + $0x30] sm:$0xff]  ;;  %v989_v4 = vsel %vm333_vm6, %v988_v30, %v971_v19 }
 0x302   : > { %2097 = vmatpush.msra.mxu0 %v2070_v9  ;;  %v2135_v57 = vmul.f32 %v2322_v39, %v2134_v54 }
 0x303   : > { %v1189_v10 = vpop.permute.xlu2 %1188 }
 0x304   : > { %v2136_v25 = vadd.f32 %v2322_v39, %v2135_v57 }
 0x305   : > { %v1153_v8 = vpop.permute.xlu1 %1152 }
 0x306   : > { %v1195_v34 = vsel %vm331_vm5, %v3793_v28, %v1153_v8  ;;  %v2138_v47 = vsel %vm2137_vm13, %v2322_v39, %v2136_v25 }
 0x307   : > { %v1369_v3 = vpop.permute.xlu0 %1368 }
 0x308   : > { %v1405_v48 = vsel %vm335_vm7, %v1404_v29, %v1369_v3 }
 0x309   : > { %v1415_v2 = vrot.slane %v1405_v48, 4 }
 0x30b   : > { %1419 = vst [vmem:[#allocation2 + $0x20] sm:$0xf0] %v1415_v2 }
 0x30d   : > { %v1397_v11 = vpop.permute.xlu1 %1396 }
 0x30e   : > { %v1412_v1 = vsel %vm335_vm7, %v1411_v42, %v1397_v11 }
 0x30f   : > { %v1416_v46 = vrot.slane %v1412_v1, 4  ;;  %v1616_v0 = vpop.permute.xlu0 %1615 }
 0x310   : > { %v1631_v33 = vsel %vm335_vm7, %v1630_v13, %v1616_v0 }
 0x311   : > { %1420 = vst [vmem:[#allocation2 + $0x28] sm:$0xf0] %v1416_v46 }
 0x312   : > { %1633 = vst [vmem:[#allocation2 + $0x38] sm:$0xf] %v1631_v33 }
 0x315   : > { %v943_v20 = vpop.permute.xlu1 %942 }
 0x316   : > { %v982_v63 = vsel %vm333_vm6, %v981_v61, %v943_v20 }
 0x317   : > { %v983_v14 = vsel %vm335_vm7, %v982_v63, %v947_v32  ;;  %v1157_v52 = vpop.permute.xlu0 %1156 }
 0x318   : > { %v993_v22 = vrot.slane %v983_v14, 4  ;;  %v1196_v59 = vsel %vm333_vm6, %v1195_v34, %v1157_v52 }
 0x319   : > { %v2071_v16 = vld [vmem:[#allocation2 + $0x38] sm:$0xff] }
 0x31a   : > { %997 = vst [vmem:[#allocation2 + $0x10] sm:$0xf0] %v993_v22  ;;  %2117 = vmatpush.msra.mxu1 %v2071_v16 }
 0x31d   : > { %v1185_v62 = vpop.permute.xlu1 %1184 }
 0x31e   : > { %v1203_v50 = vsel %vm333_vm6, %v1202_v7, %v1185_v62 }
 0x31f   : > { %v1204_v38 = vsel %vm335_vm7, %v1203_v50, %v1189_v10  ;;  %v975_v40 = vpop.permute.xlu0 %974 }
 0x320   : > { %1206 = vst [vmem:[#allocation2 + $0x28] sm:$0xf] %v1204_v38  ;;  %v990_v37 = vsel %vm335_vm7, %v989_v4, %v975_v40 }
 0x321   : > { %v994_v12 = vrot.slane %v990_v37, 4  ;;  %v2066_v28 = vld [vmem:[#allocation2 + $0x10] sm:$0xff] }
 0x323   : > { %998 = vst [vmem:[#allocation2 + $0x18] sm:$0xf0] %v994_v12 }
 0x325   : > { %v1161_v6 = vpop.permute.xlu1 %1160 }
 0x326   : > { %v1197_v55 = vsel %vm335_vm7, %v1196_v59, %v1161_v6 }
 0x327   : > { %1205 = vst [vmem:[#allocation2 + $0x20] sm:$0xf] %v1197_v55  ;;  %v2069_v49 = vld [vmem:[#allocation2 + $0x28] sm:$0xff] }
 0x328   : > { %2118 = vmatpush.msra.mxu1 %v2069_v49 }
 0x32a   : > { %v2067_v21 = vld [vmem:[#allocation2 + $0x18] sm:$0xff] }
 0x32b   : > { %2119 = vmatpush.msra.mxu1 %v2067_v21 }
 0x32d   : > { %2120 = vmatpush.msra.mxu1 %v2065_v23 }
 0x32e   : > { %v2068_v60 = vld [vmem:[#allocation2 + $0x20] sm:$0xff]  ;;  %2261 = vmatmul.msk.f32.vlgmr.msra.gmra.mxu1 %vm2074_vm12, %v2063_v45 }
 0x32f   : > { %2098 = vmatpush.msra.mxu0 %v2068_v60 }
 0x331   : > { %2099 = vmatpush.msra.mxu0 %v2066_v28 }
 0x333   : > { %2100 = vmatpush.msra.mxu0 %v2064_v26 }
 0x334   : > { %2259 = vmatmul.msk.f32.vlgmr.msra.gmra.mxu0 %vm2074_vm12, %v2063_v45 }
 0x3ab   : > { %v2122_v41 = vpop.f32.mrf.mxu1 }
 0x3ac   : > { %v2126_v31 = vmax.f32 %v2122_v41, 0.0 }
 0x3ae   : > { %v2128_v58 = vsel %vm2078_vm11, %v2126_v31, 0.0 }
 0x3b1   : > { %v2102_v35 = vpop.f32.mrf.mxu0 }
 0x3b2   : > { %v2125_v27 = vmax.f32 %v2102_v35, 0.0 }
 0x3b4   : > { %v2127_v53 = vsel %vm2078_vm11, %v2125_v27, 0.0 }
 0x3b5   : > { %v2129_v24 = vadd.f32 %v2128_v58, %v2127_v53 }
 0x3b7   : > { %2130 = vadd.xlane.f32.xlu0 %v2129_v24 }
 0x42a   : > { %v2131_v44 = vpop.xlane.xlu0 %2130 }
 0x42b   : > { %v2139_v51 = vmul.f32 %v2138_v47, %v2131_v44 }
 0x42d   : > { %v2140_v9 = vsub.f32 %v2125_v27, %v2139_v51  ;;  %v2141_v8 = vsub.f32 %v2126_v31, %v2139_v51 }
 0x42f   : > { %v2142_v56 = vmul.f32 %v2140_v9, %v2140_v9  ;;  %v2143_v29 = vmul.f32 %v2141_v8, %v2141_v8  ;;  %v2150_v18 = vmul.f32 0.1, %v2140_v9  ;;  %v2151_v32 = vmul.f32 0.1, %v2141_v8 }
 0x431   : > { %v2144_v3 = vsel %vm2078_vm11, %v2142_v56, 0.0  ;;  %v2145_v48 = vsel %vm2078_vm11, %v2143_v29, 0.0 }
 0x432   : > { %v2146_v19 = vadd.f32 %v2145_v48, %v2144_v3 }
 0x434   : > { %2147 = vadd.xlane.f32.xlu1 %v2146_v19 }
 0x4a7   : > { %v2148_v2 = vpop.xlane.xlu1 %2147 }
 0x4a8   : > { %v2149_v42 = vmul.f32 %v2148_v2, %v2138_v47 }
 0x4aa   : > { %v2152_v11 = vadd.f32 1e-05, %v2149_v42 }
 0x4ac   : > { %2323 = vrsqrt.f32 %v2152_v11  ;;  %vm2159_vm15 = vweird.f32 %v2152_v11 }
 0x4b2   : > { %v2324_v1 = vpop.eup %2323 }
 0x4b3   : > { %v2154_v36 = vmul.f32 %v2324_v1, %v2152_v11  ;;  %vm2160_vm14 = vweird.f32 %v2324_v1 }
 0x4b4   : > { %vm2161_vm0 = vmor %vm2159_vm15, %vm2160_vm14 }
 0x4b5   : > { %v2155_v46 = vmul.f32 %v2324_v1, %v2154_v36 }
 0x4b7   : > { %v2156_v13 = vmul.f32 0.5, %v2155_v46 }
 0x4b9   : > { %v2157_v0 = vsub.f32 1.5, %v2156_v13 }
 0x4bb   : > { %v2158_v33 = vmul.f32 %v2324_v1, %v2157_v0 }
 0x4bd   : > { %v2162_v20 = vsel %vm2161_vm0, %v2324_v1, %v2158_v33 }
 0x4be   : > { %v2163_v61 = vmul.f32 %v2162_v20, %v2150_v18  ;;  %v2164_v63 = vmul.f32 %v2162_v20, %v2151_v32 }
 0x4c0   : > { %v2165_v14 = vperm.slane %v2163_v61, 4  ;;  %v2166_v22 = vperm.slane %v2164_v63, 4 }
 0x4c2   : > { %v2168_v52 = vmul.f32 %v2166_v22, %v2164_v63  ;;  %v2167_v16 = vmul.f32 %v2165_v14, %v2163_v61 }
 0x4c4   : > { %v2171_v43 = vrot.slane %v2168_v52, 4 }
 0x4c6   : > { %v2173_v5 = vsel %vm2172_vm1, %v2167_v16, %v2171_v43 }
 0x4c7   : > { %2175 = vst [vmem:[%s136_s24] sm:$0xff] %v2173_v5 }
 0x4c8   : > { %2352 = shalt.err (!%p2349_p3)
}
 0x4c9   : > { %2269 = dma.vmem_to_hbm [thread:$0]  (%p2455_p5), %s2191_s25, 128, %s2193_s26, %s2177_s13  }
 0x4ca PF: > { %p2275_p4 = scmp.ge.s32.totalorder %s2387_s12, 2  ;;  %s2204_s6 = sand.u32 1, %s2375_s9  }
 0x4cb   : > { %s2205_s7 = scalar_lea.sflag [#allocation4], %s2204_s6 }
 0x4cc   : > { %p2272_p7 = pnand %p2275_p4, %p2459_p6 }
 0x4ce   : > { %p2273_p8 = pneg %p2272_p7 }
 0x4d0   : > { %2370 = dma.done.wait (%p2273_p8), %s2205_s7, 128  }
 0x4d1   : > { %2372 = vsyncadd (%p2273_p8), %s2205_s7, 4294967168  ;;  %p12_p9 = scmp.ge.s32.totalorder %s2442_s15, 4   ;;  %s3920_s9 = smov %s2379_s10 }
 0x4d2   : > { %s3921_s10 = smov %s2383_s11  ;;  %s3922_s11 = smov %s2453_s18 }
 0x4d3   : > { %s3923_s12 = smov %s2442_s15  ;;  %14 = sbr.rel (!%p12_p9) target bundleno = 3 (0x3), region = 64 }
 0x4d8   :  { %2211 = vsyncpa [#allocation4], 1 }
 0x4d9   :  { %2213 = vsyncpa [#allocation4 + $0x1], 1 }

</bundles_post_ra>
